<compile_context>
chip_gen: v5e
topology: v5e:2x2
jax: 0.10.0
libtpu: 0.0.40
codegen_flags: <defaults>
</compile_context>

<pallas_src>
import math

import jax
import jax.numpy as jnp
import numpy as np
from jax.experimental import pallas as pl
from jax.experimental.pallas import tpu as pltpu  # noqa: F401  (not needed: no grid / specs / scratch)

# ---------------- model hyperparameters (small, consistent with the module) ---
B = 2          # batch
ST = 8         # target sequence length
SS = 16        # source sequence length
D = 32         # d_model
H = 4          # n_heads
DK = D // H    # d_key
F = 64         # d_ffn
LN_EPS = 1e-5  # torch.nn.LayerNorm default
NEG = -1e30    # finite mask sentinel (robust vs. -inf softmax NaNs)
VEC_W = 128    # lane width each packed parameter row is padded to


# ---------------------------- in-kernel helpers --------------------------------
def _layer_norm(x, g, b):
    mu = jnp.mean(x, axis=-1, keepdims=True)
    var = jnp.mean((x - mu) ** 2, axis=-1, keepdims=True)
    return (x - mu) * jax.lax.rsqrt(var + LN_EPS) * g + b


def _split_heads(x):
    # (T, D) -> (H, T, DK): per-head lane slices stacked on a new leading axis
    # (cheap; avoids a lane-splitting reshape + transpose).
    return jnp.stack([x[:, h * DK:(h + 1) * DK] for h in range(H)], axis=0)


def _merge_heads(a):
    # (H, T, DK) -> (T, D)
    return jnp.concatenate([a[h] for h in range(H)], axis=-1)


def _attention(q, k, v, mask, scale):
    """q: (Tq, D); k, v: (Tk, D); mask broadcastable to (H, Tq, Tk)."""
    qh, kh, vh = _split_heads(q), _split_heads(k), _split_heads(v)
    s = jnp.einsum("hqd,hkd->hqk", qh, kh,
                   preferred_element_type=jnp.float32) * scale     # (H, Tq, Tk)
    s = jnp.where(mask == 0, NEG, s)
    m = jnp.max(s, axis=-1, keepdims=True)
    e = jnp.exp(s - m)
    p = e / jnp.sum(e, axis=-1, keepdims=True)
    a = jnp.einsum("hqk,hkd->hqd", p, vh,
                   preferred_element_type=jnp.float32)              # (H, Tq, DK)
    return _merge_heads(a), p


# --------------------------------- kernel --------------------------------------
def decoder_layer_kernel(trg_ref, src_ref, tmask_ref, smask_ref,
                         w_sqkv_ref, w_ckv_ref, w_f1_ref, w_outs_ref, vec_ref,
                         out_ref, cross_ref, mself_ref):
    x = trg_ref[...].astype(jnp.float32)      # (B*ST, D)
    xs = src_ref[...].astype(jnp.float32)     # (B*SS, D)

    # ---- unpack the parameter blobs (static, tile-aligned slices) ----
    vec = vec_ref[...]                        # (13, VEC_W)
    b_sqkv = vec[0:1, :3 * D]
    bo1, g1, be1 = vec[1:2, :D], vec[2:3, :D], vec[3:4, :D]
    bq2 = vec[4:5, :D]
    b_ckv = vec[5:6, :2 * D]
    bo2, g2, be2 = vec[6:7, :D], vec[7:8, :D], vec[8:9, :D]
    bf1 = vec[9:10, :F]
    bf2, g3, be3 = vec[10:11, :D], vec[11:12, :D], vec[12:13, :D]

    w_outs = w_outs_ref[...]                  # (3D+F, D)
    wo1 = w_outs[0:D]
    wq2 = w_outs[D:2 * D]
    wo2 = w_outs[2 * D:3 * D]
    wf2 = w_outs[3 * D:3 * D + F]

    scale = 1.0 / math.sqrt(DK)

    # ---------- masked self-attention (fused QKV over the whole batch) ----------
    qkv = jnp.dot(x, w_sqkv_ref[...], preferred_element_type=jnp.float32) + b_sqkv
    a_rows = []
    for b in range(B):                        # tiny static batch loop (B=2)
        qkv_b = qkv[b * ST:(b + 1) * ST]      # (ST, 3D)
        a, p = _attention(qkv_b[:, 0:D], qkv_b[:, D:2 * D], qkv_b[:, 2 * D:3 * D],
                          tmask_ref[b, 0], scale)
        mself_ref[b] = p                      # (H, ST, ST)
        a_rows.append(a)
    a_self = jnp.concatenate(a_rows, axis=0)  # (B*ST, D)
    t1 = _layer_norm(
        x + jnp.dot(a_self, wo1, preferred_element_type=jnp.float32) + bo1, g1, be1)

    # ---------- cross attention (query from trg, fused K/V from src) ------------
    qc = jnp.dot(t1, wq2, preferred_element_type=jnp.float32) + bq2      # (B*ST, D)
    kv = jnp.dot(xs, w_ckv_ref[...], preferred_element_type=jnp.float32) + b_ckv
    a_rows = []
    for b in range(B):
        kv_b = kv[b * SS:(b + 1) * SS]        # (SS, 2D)
        a, p = _attention(qc[b * ST:(b + 1) * ST], kv_b[:, 0:D], kv_b[:, D:2 * D],
                          smask_ref[b, 0], scale)
        cross_ref[b] = p                      # (H, ST, SS)
        a_rows.append(a)
    a_cross = jnp.concatenate(a_rows, axis=0)
    t2 = _layer_norm(
        t1 + jnp.dot(a_cross, wo2, preferred_element_type=jnp.float32) + bo2, g2, be2)

    # ---------- position-wise FFN -----------------------------------------------
    hdn = jnp.maximum(
        jnp.dot(t2, w_f1_ref[...], preferred_element_type=jnp.float32) + bf1, 0.0)
    ffn = jnp.dot(hdn, wf2, preferred_element_type=jnp.float32) + bf2
    t3 = _layer_norm(t2 + ffn, g3, be3)

    out_ref[...] = t3.astype(out_ref.dtype)   # single full-block store


# -------------------------------- wrapper ---------------------------------------
def decoder_layer(trg, src, trg_mask, src_mask, kernel_params):
    """trg: (B,ST,D); src: (B,SS,D); trg_mask: (B,1,ST,ST); src_mask: (B,1,1,SS)."""
    w_sqkv, w_ckv, w_f1, w_outs, vec = kernel_params
    out2, cross, mself = pl.pallas_call(
        decoder_layer_kernel,
        out_shape=(
            jax.ShapeDtypeStruct((B * ST, D), jnp.float32),    # decoder output (flat)
            jax.ShapeDtypeStruct((B, H, ST, SS), jnp.float32),  # cross-attn probs
            jax.ShapeDtypeStruct((B, H, ST, ST), jnp.float32),  # masked self-attn probs
        ),
    )(trg.reshape(B * ST, D), src.reshape(B * SS, D), trg_mask, src_mask,
      w_sqkv, w_ckv, w_f1, w_outs, vec)
    return out2.reshape(B, ST, D), cross, mself


def pack_params(p):
    """Fuse / pack the torch-style (in,out)-oriented parameters for the kernel."""
    (wq1, bq1, wk1, bk1, wv1, bv1, wo1, bo1, g1, be1,
     wq2, bq2, wk2, bk2, wv2, bv2, wo2, bo2, g2, be2,
     wf1, bf1, wf2, bf2, g3, be3) = p
    w_sqkv = jnp.concatenate([wq1, wk1, wv1], axis=1)        # (D, 3D)
    w_ckv = jnp.concatenate([wk2, wv2], axis=1)              # (D, 2D)
    w_outs = jnp.concatenate([wo1, wq2, wo2, wf2], axis=0)   # (3D+F, D)

    def row(v):
        v = jnp.asarray(v).reshape(-1)
        return jnp.pad(v, (0, VEC_W - v.shape[0]))

    vec = jnp.stack([
        row(jnp.concatenate([bq1, bk1, bv1])),   # 0: self QKV bias (3D)
        row(bo1), row(g1), row(be1),             # 1..3
        row(bq2),                                # 4
        row(jnp.concatenate([bk2, bv2])),        # 5: cross KV bias (2D)
        row(bo2), row(g2), row(be2),             # 6..8
        row(bf1),                                # 9  (F)
        row(bf2), row(g3), row(be3),             # 10..12
    ])                                            # (13, VEC_W)
    return (w_sqkv, w_ckv, wf1, w_outs, vec)


# ------------------------- pure-JAX reference (verification) --------------------
def _mha_ref(q_in, k_in, v_in, mask, wq, bq, wk, bk, wv, bv, wo, bo):
    bsz, tq, _ = q_in.shape
    tk = k_in.shape[1]
    Q = (q_in @ wq + bq).reshape(bsz, tq, H, DK).transpose(0, 2, 1, 3)
    K = (k_in @ wk + bk).reshape(bsz, tk, H, DK).transpose(0, 2, 1, 3)
    V = (v_in @ wv + bv).reshape(bsz, tk, H, DK).transpose(0, 2, 1, 3)
    s = jnp.einsum("bhqd,bhkd->bhqk", Q, K) / math.sqrt(DK)
    s = jnp.where(mask == 0, -jnp.inf, s)
    p = jax.nn.softmax(s, axis=-1)
    a = jnp.einsum("bhqk,bhkd->bhqd", p, V).transpose(0, 2, 1, 3).reshape(bsz, tq, D)
    return a @ wo + bo, p


def _ln_ref(x, g, b):
    mu = x.mean(-1, keepdims=True)
    var = ((x - mu) ** 2).mean(-1, keepdims=True)
    return (x - mu) / jnp.sqrt(var + LN_EPS) * g + b


def decoder_layer_ref(trg, src, trg_mask, src_mask, p):
    (wq1, bq1, wk1, bk1, wv1, bv1, wo1, bo1, g1, be1,
     wq2, bq2, wk2, bk2, wv2, bv2, wo2, bo2, g2, be2,
     wf1, bf1, wf2, bf2, g3, be3) = p
    _t, mp = _mha_ref(trg, trg, trg, trg_mask, wq1, bq1, wk1, bk1, wv1, bv1, wo1, bo1)
    t = _ln_ref(trg + _t, g1, be1)
    _t, cp = _mha_ref(t, src, src, src_mask, wq2, bq2, wk2, bk2, wv2, bv2, wo2, bo2)
    t = _ln_ref(t + _t, g2, be2)
    _t = jnp.maximum(t @ wf1 + bf1, 0.0) @ wf2 + bf2
    t = _ln_ref(t + _t, g3, be3)
    return t, cp, mp


# ----------------------------------- main ---------------------------------------
if __name__ == "__main__":
    key = jax.random.PRNGKey(0)
    ks = jax.random.split(key, 32)

    def init(k, shape, scale=0.1):
        return jax.random.normal(k, shape, jnp.float32) * scale

    params = (
        init(ks[0], (D, D)), init(ks[1], (D,)),      # self Wq, bq
        init(ks[2], (D, D)), init(ks[3], (D,)),      # self Wk, bk
        init(ks[4], (D, D)), init(ks[5], (D,)),      # self Wv, bv
        init(ks[6], (D, D)), init(ks[7], (D,)),      # self Wo, bo
        jnp.ones((D,), jnp.float32), jnp.zeros((D,), jnp.float32),   # LN1 (gamma, beta)
        init(ks[8], (D, D)), init(ks[9], (D,)),      # cross Wq, bq
        init(ks[10], (D, D)), init(ks[11], (D,)),    # cross Wk, bk
        init(ks[12], (D, D)), init(ks[13], (D,)),    # cross Wv, bv
        init(ks[14], (D, D)), init(ks[15], (D,)),    # cross Wo, bo
        jnp.ones((D,), jnp.float32), jnp.zeros((D,), jnp.float32),   # LN2
        init(ks[16], (D, F)), init(ks[17], (F,)),    # FFN W1, b1
        init(ks[18], (F, D)), init(ks[19], (D,)),    # FFN W2, b2
        jnp.ones((D,), jnp.float32), jnp.zeros((D,), jnp.float32),   # LN3
    )

    trg = jax.random.normal(ks[20], (B, ST, D), jnp.float32)
    src = jax.random.normal(ks[21], (B, SS, D), jnp.float32)

    # causal target mask; batch 1 additionally has its last target key padded
    tm = np.broadcast_to(np.tril(np.ones((ST, ST), np.float32)), (B, 1, ST, ST)).copy()
    tm[1, 0, :, -1] = 0.0
    trg_mask = jnp.asarray(tm)
    # source padding mask: last 3 source positions of batch 1 are padding
    sm = np.ones((B, 1, 1, SS), np.float32)
    sm[1, 0, 0, -3:] = 0.0
    src_mask = jnp.asarray(sm)

    kp = pack_params(params)
    out, cross, mself = decoder_layer(trg, src, trg_mask, src_mask, kp)
    out = jax.block_until_ready(out)
    cross = jax.block_until_ready(cross)
    mself = jax.block_until_ready(mself)

    with jax.default_matmul_precision("highest"):
        out_r, cross_r, mself_r = decoder_layer_ref(trg, src, trg_mask, src_mask, params)

    np.testing.assert_allclose(np.asarray(out), np.asarray(out_r), atol=2e-4, rtol=2e-4)
    np.testing.assert_allclose(np.asarray(cross), np.asarray(cross_r), atol=5e-5, rtol=5e-4)
    np.testing.assert_allclose(np.asarray(mself), np.asarray(mself_r), atol=5e-5, rtol=5e-4)

    # TODO(synk): dropout layers are treated as identity (eval-mode semantics).
    print("KERNEL_OK")
</pallas_src>

<mosaic_0001>
module attributes {stable_mosaic.version = 11 : i64} {
  func.func @decoder_layer_kernel(%arg0: memref<16x32xf32, #tpu.memory_space<vmem>>, %arg1: memref<32x32xf32, #tpu.memory_space<vmem>>, %arg2: memref<2x1x8x8xf32, #tpu.memory_space<vmem>>, %arg3: memref<2x1x1x16xf32, #tpu.memory_space<vmem>>, %arg4: memref<32x96xf32, #tpu.memory_space<vmem>>, %arg5: memref<32x64xf32, #tpu.memory_space<vmem>>, %arg6: memref<32x64xf32, #tpu.memory_space<vmem>>, %arg7: memref<160x32xf32, #tpu.memory_space<vmem>>, %arg8: memref<13x128xf32, #tpu.memory_space<vmem>>, %arg9: memref<16x32xf32, #tpu.memory_space<vmem>>, %arg10: memref<2x4x8x16xf32, #tpu.memory_space<vmem>>, %arg11: memref<2x4x8x8xf32, #tpu.memory_space<vmem>>) attributes {dimension_semantics = [], scalar_prefetch = 0 : i64, scratch_operands = 0 : i64, tpu.core_type = #tpu.core_type<tc>} {
    %c0 = arith.constant 0 : index
    %c0_0 = arith.constant 0 : index
    %0 = vector.load %arg0[%c0, %c0_0] : memref<16x32xf32, #tpu.memory_space<vmem>>, vector<16x32xf32>
    %c0_1 = arith.constant 0 : index
    %c0_2 = arith.constant 0 : index
    %1 = vector.load %arg1[%c0_1, %c0_2] : memref<32x32xf32, #tpu.memory_space<vmem>>, vector<32x32xf32>
    %c0_3 = arith.constant 0 : index
    %c0_4 = arith.constant 0 : index
    %2 = vector.load %arg8[%c0_3, %c0_4] : memref<13x128xf32, #tpu.memory_space<vmem>>, vector<13x128xf32>
    %3 = vector.extract_strided_slice %2 {offsets = [0, 0], sizes = [1, 96], strides = [1, 1]} : vector<13x128xf32> to vector<1x96xf32>
    %4 = vector.extract_strided_slice %2 {offsets = [1, 0], sizes = [1, 32], strides = [1, 1]} : vector<13x128xf32> to vector<1x32xf32>
    %5 = vector.extract_strided_slice %2 {offsets = [2, 0], sizes = [1, 32], strides = [1, 1]} : vector<13x128xf32> to vector<1x32xf32>
    %6 = vector.extract_strided_slice %2 {offsets = [3, 0], sizes = [1, 32], strides = [1, 1]} : vector<13x128xf32> to vector<1x32xf32>
    %7 = vector.extract_strided_slice %2 {offsets = [4, 0], sizes = [1, 32], strides = [1, 1]} : vector<13x128xf32> to vector<1x32xf32>
    %8 = vector.extract_strided_slice %2 {offsets = [5, 0], sizes = [1, 64], strides = [1, 1]} : vector<13x128xf32> to vector<1x64xf32>
    %9 = vector.extract_strided_slice %2 {offsets = [6, 0], sizes = [1, 32], strides = [1, 1]} : vector<13x128xf32> to vector<1x32xf32>
    %10 = vector.extract_strided_slice %2 {offsets = [7, 0], sizes = [1, 32], strides = [1, 1]} : vector<13x128xf32> to vector<1x32xf32>
    %11 = vector.extract_strided_slice %2 {offsets = [8, 0], sizes = [1, 32], strides = [1, 1]} : vector<13x128xf32> to vector<1x32xf32>
    %12 = vector.extract_strided_slice %2 {offsets = [9, 0], sizes = [1, 64], strides = [1, 1]} : vector<13x128xf32> to vector<1x64xf32>
    %13 = vector.extract_strided_slice %2 {offsets = [10, 0], sizes = [1, 32], strides = [1, 1]} : vector<13x128xf32> to vector<1x32xf32>
    %14 = vector.extract_strided_slice %2 {offsets = [11, 0], sizes = [1, 32], strides = [1, 1]} : vector<13x128xf32> to vector<1x32xf32>
    %15 = vector.extract_strided_slice %2 {offsets = [12, 0], sizes = [1, 32], strides = [1, 1]} : vector<13x128xf32> to vector<1x32xf32>
    %c0_5 = arith.constant 0 : index
    %c0_6 = arith.constant 0 : index
    %16 = vector.load %arg7[%c0_5, %c0_6] : memref<160x32xf32, #tpu.memory_space<vmem>>, vector<160x32xf32>
    %17 = vector.extract_strided_slice %16 {offsets = [0, 0], sizes = [32, 32], strides = [1, 1]} : vector<160x32xf32> to vector<32x32xf32>
    %18 = vector.extract_strided_slice %16 {offsets = [32, 0], sizes = [32, 32], strides = [1, 1]} : vector<160x32xf32> to vector<32x32xf32>
    %19 = vector.extract_strided_slice %16 {offsets = [64, 0], sizes = [32, 32], strides = [1, 1]} : vector<160x32xf32> to vector<32x32xf32>
    %20 = vector.extract_strided_slice %16 {offsets = [96, 0], sizes = [64, 32], strides = [1, 1]} : vector<160x32xf32> to vector<64x32xf32>
    %c0_7 = arith.constant 0 : index
    %c0_8 = arith.constant 0 : index
    %21 = vector.load %arg4[%c0_7, %c0_8] : memref<32x96xf32, #tpu.memory_space<vmem>>, vector<32x96xf32>
    %cst = arith.constant dense<0.000000e+00> : vector<16x96xf32>
    %22 = tpu.matmul %0, %21, %cst {dimension_numbers = #tpu.dot_dimension_numbers<[1], [0], [0], [1], [0, 0, 1, 1], [], []>} : vector<16x32xf32>, vector<32x96xf32>, vector<16x96xf32> -> vector<16x96xf32>
    %23 = vector.broadcast %3 : vector<1x96xf32> to vector<16x96xf32>
    %24 = arith.addf %22, %23 : vector<16x96xf32>
    %25 = vector.extract_strided_slice %24 {offsets = [0, 0], sizes = [8, 96], strides = [1, 1]} : vector<16x96xf32> to vector<8x96xf32>
    %26 = vector.extract_strided_slice %25 {offsets = [0, 0], sizes = [8, 32], strides = [1, 1]} : vector<8x96xf32> to vector<8x32xf32>
    %27 = vector.extract_strided_slice %25 {offsets = [0, 32], sizes = [8, 32], strides = [1, 1]} : vector<8x96xf32> to vector<8x32xf32>
    %28 = vector.extract_strided_slice %25 {offsets = [0, 64], sizes = [8, 32], strides = [1, 1]} : vector<8x96xf32> to vector<8x32xf32>
    %c0_9 = arith.constant 0 : index
    %c0_10 = arith.constant 0 : index
    %c0_11 = arith.constant 0 : index
    %c0_12 = arith.constant 0 : index
    %29 = vector.load %arg2[%c0_9, %c0_10, %c0_11, %c0_12] : memref<2x1x8x8xf32, #tpu.memory_space<vmem>>, vector<1x1x8x8xf32>
    %30 = vector.shape_cast %29 : vector<1x1x8x8xf32> to vector<8x8xf32>
    %31 = vector.extract_strided_slice %26 {offsets = [0, 0], sizes = [8, 8], strides = [1, 1]} : vector<8x32xf32> to vector<8x8xf32>
    %32 = vector.extract_strided_slice %26 {offsets = [0, 8], sizes = [8, 8], strides = [1, 1]} : vector<8x32xf32> to vector<8x8xf32>
    %33 = vector.extract_strided_slice %26 {offsets = [0, 16], sizes = [8, 8], strides = [1, 1]} : vector<8x32xf32> to vector<8x8xf32>
    %34 = vector.extract_strided_slice %26 {offsets = [0, 24], sizes = [8, 8], strides = [1, 1]} : vector<8x32xf32> to vector<8x8xf32>
    %35 = vector.shape_cast %31 : vector<8x8xf32> to vector<1x8x8xf32>
    %36 = vector.shape_cast %32 : vector<8x8xf32> to vector<1x8x8xf32>
    %37 = vector.shape_cast %33 : vector<8x8xf32> to vector<1x8x8xf32>
    %38 = vector.shape_cast %34 : vector<8x8xf32> to vector<1x8x8xf32>
    %39 = tpu.concatenate %35, %36, %37, %38 in 0 : vector<1x8x8xf32>, vector<1x8x8xf32>, vector<1x8x8xf32>, vector<1x8x8xf32> -> vector<4x8x8xf32>
    %40 = vector.extract_strided_slice %27 {offsets = [0, 0], sizes = [8, 8], strides = [1, 1]} : vector<8x32xf32> to vector<8x8xf32>
    %41 = vector.extract_strided_slice %27 {offsets = [0, 8], sizes = [8, 8], strides = [1, 1]} : vector<8x32xf32> to vector<8x8xf32>
    %42 = vector.extract_strided_slice %27 {offsets = [0, 16], sizes = [8, 8], strides = [1, 1]} : vector<8x32xf32> to vector<8x8xf32>
    %43 = vector.extract_strided_slice %27 {offsets = [0, 24], sizes = [8, 8], strides = [1, 1]} : vector<8x32xf32> to vector<8x8xf32>
    %44 = vector.shape_cast %40 : vector<8x8xf32> to vector<1x8x8xf32>
    %45 = vector.shape_cast %41 : vector<8x8xf32> to vector<1x8x8xf32>
    %46 = vector.shape_cast %42 : vector<8x8xf32> to vector<1x8x8xf32>
    %47 = vector.shape_cast %43 : vector<8x8xf32> to vector<1x8x8xf32>
    %48 = tpu.concatenate %44, %45, %46, %47 in 0 : vector<1x8x8xf32>, vector<1x8x8xf32>, vector<1x8x8xf32>, vector<1x8x8xf32> -> vector<4x8x8xf32>
    %49 = vector.extract_strided_slice %28 {offsets = [0, 0], sizes = [8, 8], strides = [1, 1]} : vector<8x32xf32> to vector<8x8xf32>
    %50 = vector.extract_strided_slice %28 {offsets = [0, 8], sizes = [8, 8], strides = [1, 1]} : vector<8x32xf32> to vector<8x8xf32>
    %51 = vector.extract_strided_slice %28 {offsets = [0, 16], sizes = [8, 8], strides = [1, 1]} : vector<8x32xf32> to vector<8x8xf32>
    %52 = vector.extract_strided_slice %28 {offsets = [0, 24], sizes = [8, 8], strides = [1, 1]} : vector<8x32xf32> to vector<8x8xf32>
    %53 = vector.shape_cast %49 : vector<8x8xf32> to vector<1x8x8xf32>
    %54 = vector.shape_cast %50 : vector<8x8xf32> to vector<1x8x8xf32>
    %55 = vector.shape_cast %51 : vector<8x8xf32> to vector<1x8x8xf32>
    %56 = vector.shape_cast %52 : vector<8x8xf32> to vector<1x8x8xf32>
    %57 = tpu.concatenate %53, %54, %55, %56 in 0 : vector<1x8x8xf32>, vector<1x8x8xf32>, vector<1x8x8xf32>, vector<1x8x8xf32> -> vector<4x8x8xf32>
    "tpu.trace_start"() <{level = 10 : i32, message = "hqd,hkd->hqk"}> : () -> ()
    %cst_13 = arith.constant dense<0.000000e+00> : vector<4x8x8xf32>
    %58 = tpu.matmul %39, %48, %cst_13 {dimension_numbers = #tpu.dot_dimension_numbers<[2], [2], [1], [1], [0, 0, 0, 1, 1, 1], [0], [0]>} : vector<4x8x8xf32>, vector<4x8x8xf32>, vector<4x8x8xf32> -> vector<4x8x8xf32>
    "tpu.trace_stop"() : () -> ()
    %cst_14 = arith.constant 0.353553385 : f32
    %59 = vector.broadcast %cst_14 : f32 to vector<4x8x8xf32>
    %60 = arith.mulf %58, %59 : vector<4x8x8xf32>
    %cst_15 = arith.constant 0.000000e+00 : f32
    %61 = vector.broadcast %cst_15 : f32 to vector<8x8xf32>
    %62 = arith.cmpf oeq, %30, %61 : vector<8x8xf32>
    %cst_16 = arith.constant -1.000000e+30 : f32
    %63 = vector.shape_cast %62 : vector<8x8xi1> to vector<1x8x8xi1>
    %64 = vector.broadcast %63 : vector<1x8x8xi1> to vector<4x8x8xi1>
    %65 = vector.broadcast %cst_16 : f32 to vector<4x8x8xf32>
    %66 = arith.select %64, %65, %60 : vector<4x8x8xi1>, vector<4x8x8xf32>
    %cst_17 = arith.constant dense<0xFF800000> : vector<4x8xf32>
    %67 = vector.multi_reduction <maximumf>, %66, %cst_17 [2] : vector<4x8x8xf32> to vector<4x8xf32>
    %68 = vector.shape_cast %67 : vector<4x8xf32> to vector<4x8x1xf32>
    %69 = vector.broadcast %68 : vector<4x8x1xf32> to vector<4x8x8xf32>
    %70 = arith.subf %66, %69 : vector<4x8x8xf32>
    %71 = math.exp %70 : vector<4x8x8xf32>
    %cst_18 = arith.constant dense<0.000000e+00> : vector<4x8xf32>
    %72 = vector.multi_reduction <add>, %71, %cst_18 [2] : vector<4x8x8xf32> to vector<4x8xf32>
    %73 = vector.shape_cast %72 : vector<4x8xf32> to vector<4x8x1xf32>
    %74 = vector.broadcast %73 : vector<4x8x1xf32> to vector<4x8x8xf32>
    %75 = arith.divf %71, %74 : vector<4x8x8xf32>
    "tpu.trace_start"() <{level = 10 : i32, message = "hqk,hkd->hqd"}> : () -> ()
    %cst_19 = arith.constant dense<0.000000e+00> : vector<4x8x8xf32>
    %76 = tpu.matmul %75, %57, %cst_19 {dimension_numbers = #tpu.dot_dimension_numbers<[2], [1], [1], [2], [0, 0, 0, 1, 1, 2], [0], [0]>} : vector<4x8x8xf32>, vector<4x8x8xf32>, vector<4x8x8xf32> -> vector<4x8x8xf32>
    "tpu.trace_stop"() : () -> ()
    %77 = vector.extract_strided_slice %76 {offsets = [0, 0, 0], sizes = [1, 8, 8], strides = [1, 1, 1]} : vector<4x8x8xf32> to vector<1x8x8xf32>
    %78 = vector.shape_cast %77 : vector<1x8x8xf32> to vector<8x8xf32>
    %79 = vector.extract_strided_slice %76 {offsets = [1, 0, 0], sizes = [1, 8, 8], strides = [1, 1, 1]} : vector<4x8x8xf32> to vector<1x8x8xf32>
    %80 = vector.shape_cast %79 : vector<1x8x8xf32> to vector<8x8xf32>
    %81 = vector.extract_strided_slice %76 {offsets = [2, 0, 0], sizes = [1, 8, 8], strides = [1, 1, 1]} : vector<4x8x8xf32> to vector<1x8x8xf32>
    %82 = vector.shape_cast %81 : vector<1x8x8xf32> to vector<8x8xf32>
    %83 = vector.extract_strided_slice %76 {offsets = [3, 0, 0], sizes = [1, 8, 8], strides = [1, 1, 1]} : vector<4x8x8xf32> to vector<1x8x8xf32>
    %84 = vector.shape_cast %83 : vector<1x8x8xf32> to vector<8x8xf32>
    %85 = tpu.concatenate %78, %80, %82, %84 in 1 : vector<8x8xf32>, vector<8x8xf32>, vector<8x8xf32>, vector<8x8xf32> -> vector<8x32xf32>
    %c0_20 = arith.constant 0 : index
    %c0_21 = arith.constant 0 : index
    %c0_22 = arith.constant 0 : index
    %c0_23 = arith.constant 0 : index
    %86 = vector.load %arg11[%c0_20, %c0_21, %c0_22, %c0_23] : memref<2x4x8x8xf32, #tpu.memory_space<vmem>>, vector<1x4x8x8xf32>
    %87 = vector.shape_cast %86 : vector<1x4x8x8xf32> to vector<4x8x8xf32>
    %88 = vector.shape_cast %75 : vector<4x8x8xf32> to vector<1x4x8x8xf32>
    tpu.vector_store %arg11[%c0_20, %c0_21, %c0_22, %c0_23], %88 {strides = array<i32>} : memref<2x4x8x8xf32, #tpu.memory_space<vmem>>, vector<1x4x8x8xf32>,
    %89 = vector.extract_strided_slice %24 {offsets = [8, 0], sizes = [8, 96], strides = [1, 1]} : vector<16x96xf32> to vector<8x96xf32>
    %90 = vector.extract_strided_slice %89 {offsets = [0, 0], sizes = [8, 32], strides = [1, 1]} : vector<8x96xf32> to vector<8x32xf32>
    %91 = vector.extract_strided_slice %89 {offsets = [0, 32], sizes = [8, 32], strides = [1, 1]} : vector<8x96xf32> to vector<8x32xf32>
    %92 = vector.extract_strided_slice %89 {offsets = [0, 64], sizes = [8, 32], strides = [1, 1]} : vector<8x96xf32> to vector<8x32xf32>
    %c1 = arith.constant 1 : index
    %c0_24 = arith.constant 0 : index
    %c0_25 = arith.constant 0 : index
    %c0_26 = arith.constant 0 : index
    %93 = vector.load %arg2[%c1, %c0_24, %c0_25, %c0_26] : memref<2x1x8x8xf32, #tpu.memory_space<vmem>>, vector<1x1x8x8xf32>
    %94 = vector.shape_cast %93 : vector<1x1x8x8xf32> to vector<8x8xf32>
    %95 = vector.extract_strided_slice %90 {offsets = [0, 0], sizes = [8, 8], strides = [1, 1]} : vector<8x32xf32> to vector<8x8xf32>
    %96 = vector.extract_strided_slice %90 {offsets = [0, 8], sizes = [8, 8], strides = [1, 1]} : vector<8x32xf32> to vector<8x8xf32>
    %97 = vector.extract_strided_slice %90 {offsets = [0, 16], sizes = [8, 8], strides = [1, 1]} : vector<8x32xf32> to vector<8x8xf32>
    %98 = vector.extract_strided_slice %90 {offsets = [0, 24], sizes = [8, 8], strides = [1, 1]} : vector<8x32xf32> to vector<8x8xf32>
    %99 = vector.shape_cast %95 : vector<8x8xf32> to vector<1x8x8xf32>
    %100 = vector.shape_cast %96 : vector<8x8xf32> to vector<1x8x8xf32>
    %101 = vector.shape_cast %97 : vector<8x8xf32> to vector<1x8x8xf32>
    %102 = vector.shape_cast %98 : vector<8x8xf32> to vector<1x8x8xf32>
    %103 = tpu.concatenate %99, %100, %101, %102 in 0 : vector<1x8x8xf32>, vector<1x8x8xf32>, vector<1x8x8xf32>, vector<1x8x8xf32> -> vector<4x8x8xf32>
    %104 = vector.extract_strided_slice %91 {offsets = [0, 0], sizes = [8, 8], strides = [1, 1]} : vector<8x32xf32> to vector<8x8xf32>
    %105 = vector.extract_strided_slice %91 {offsets = [0, 8], sizes = [8, 8], strides = [1, 1]} : vector<8x32xf32> to vector<8x8xf32>
    %106 = vector.extract_strided_slice %91 {offsets = [0, 16], sizes = [8, 8], strides = [1, 1]} : vector<8x32xf32> to vector<8x8xf32>
    %107 = vector.extract_strided_slice %91 {offsets = [0, 24], sizes = [8, 8], strides = [1, 1]} : vector<8x32xf32> to vector<8x8xf32>
    %108 = vector.shape_cast %104 : vector<8x8xf32> to vector<1x8x8xf32>
    %109 = vector.shape_cast %105 : vector<8x8xf32> to vector<1x8x8xf32>
    %110 = vector.shape_cast %106 : vector<8x8xf32> to vector<1x8x8xf32>
    %111 = vector.shape_cast %107 : vector<8x8xf32> to vector<1x8x8xf32>
    %112 = tpu.concatenate %108, %109, %110, %111 in 0 : vector<1x8x8xf32>, vector<1x8x8xf32>, vector<1x8x8xf32>, vector<1x8x8xf32> -> vector<4x8x8xf32>
    %113 = vector.extract_strided_slice %92 {offsets = [0, 0], sizes = [8, 8], strides = [1, 1]} : vector<8x32xf32> to vector<8x8xf32>
    %114 = vector.extract_strided_slice %92 {offsets = [0, 8], sizes = [8, 8], strides = [1, 1]} : vector<8x32xf32> to vector<8x8xf32>
    %115 = vector.extract_strided_slice %92 {offsets = [0, 16], sizes = [8, 8], strides = [1, 1]} : vector<8x32xf32> to vector<8x8xf32>
    %116 = vector.extract_strided_slice %92 {offsets = [0, 24], sizes = [8, 8], strides = [1, 1]} : vector<8x32xf32> to vector<8x8xf32>
    %117 = vector.shape_cast %113 : vector<8x8xf32> to vector<1x8x8xf32>
    %118 = vector.shape_cast %114 : vector<8x8xf32> to vector<1x8x8xf32>
    %119 = vector.shape_cast %115 : vector<8x8xf32> to vector<1x8x8xf32>
    %120 = vector.shape_cast %116 : vector<8x8xf32> to vector<1x8x8xf32>
    %121 = tpu.concatenate %117, %118, %119, %120 in 0 : vector<1x8x8xf32>, vector<1x8x8xf32>, vector<1x8x8xf32>, vector<1x8x8xf32> -> vector<4x8x8xf32>
    "tpu.trace_start"() <{level = 10 : i32, message = "hqd,hkd->hqk"}> : () -> ()
    %cst_27 = arith.constant dense<0.000000e+00> : vector<4x8x8xf32>
    %122 = tpu.matmul %103, %112, %cst_27 {dimension_numbers = #tpu.dot_dimension_numbers<[2], [2], [1], [1], [0, 0, 0, 1, 1, 1], [0], [0]>} : vector<4x8x8xf32>, vector<4x8x8xf32>, vector<4x8x8xf32> -> vector<4x8x8xf32>
    "tpu.trace_stop"() : () -> ()
    %cst_28 = arith.constant 0.353553385 : f32
    %123 = vector.broadcast %cst_28 : f32 to vector<4x8x8xf32>
    %124 = arith.mulf %122, %123 : vector<4x8x8xf32>
    %cst_29 = arith.constant 0.000000e+00 : f32
    %125 = vector.broadcast %cst_29 : f32 to vector<8x8xf32>
    %126 = arith.cmpf oeq, %94, %125 : vector<8x8xf32>
    %cst_30 = arith.constant -1.000000e+30 : f32
    %127 = vector.shape_cast %126 : vector<8x8xi1> to vector<1x8x8xi1>
    %128 = vector.broadcast %127 : vector<1x8x8xi1> to vector<4x8x8xi1>
    %129 = vector.broadcast %cst_30 : f32 to vector<4x8x8xf32>
    %130 = arith.select %128, %129, %124 : vector<4x8x8xi1>, vector<4x8x8xf32>
    %cst_31 = arith.constant dense<0xFF800000> : vector<4x8xf32>
    %131 = vector.multi_reduction <maximumf>, %130, %cst_31 [2] : vector<4x8x8xf32> to vector<4x8xf32>
    %132 = vector.shape_cast %131 : vector<4x8xf32> to vector<4x8x1xf32>
    %133 = vector.broadcast %132 : vector<4x8x1xf32> to vector<4x8x8xf32>
    %134 = arith.subf %130, %133 : vector<4x8x8xf32>
    %135 = math.exp %134 : vector<4x8x8xf32>
    %cst_32 = arith.constant dense<0.000000e+00> : vector<4x8xf32>
    %136 = vector.multi_reduction <add>, %135, %cst_32 [2] : vector<4x8x8xf32> to vector<4x8xf32>
    %137 = vector.shape_cast %136 : vector<4x8xf32> to vector<4x8x1xf32>
    %138 = vector.broadcast %137 : vector<4x8x1xf32> to vector<4x8x8xf32>
    %139 = arith.divf %135, %138 : vector<4x8x8xf32>
    "tpu.trace_start"() <{level = 10 : i32, message = "hqk,hkd->hqd"}> : () -> ()
    %cst_33 = arith.constant dense<0.000000e+00> : vector<4x8x8xf32>
    %140 = tpu.matmul %139, %121, %cst_33 {dimension_numbers = #tpu.dot_dimension_numbers<[2], [1], [1], [2], [0, 0, 0, 1, 1, 2], [0], [0]>} : vector<4x8x8xf32>, vector<4x8x8xf32>, vector<4x8x8xf32> -> vector<4x8x8xf32>
    "tpu.trace_stop"() : () -> ()
    %141 = vector.extract_strided_slice %140 {offsets = [0, 0, 0], sizes = [1, 8, 8], strides = [1, 1, 1]} : vector<4x8x8xf32> to vector<1x8x8xf32>
    %142 = vector.shape_cast %141 : vector<1x8x8xf32> to vector<8x8xf32>
    %143 = vector.extract_strided_slice %140 {offsets = [1, 0, 0], sizes = [1, 8, 8], strides = [1, 1, 1]} : vector<4x8x8xf32> to vector<1x8x8xf32>
    %144 = vector.shape_cast %143 : vector<1x8x8xf32> to vector<8x8xf32>
    %145 = vector.extract_strided_slice %140 {offsets = [2, 0, 0], sizes = [1, 8, 8], strides = [1, 1, 1]} : vector<4x8x8xf32> to vector<1x8x8xf32>
    %146 = vector.shape_cast %145 : vector<1x8x8xf32> to vector<8x8xf32>
    %147 = vector.extract_strided_slice %140 {offsets = [3, 0, 0], sizes = [1, 8, 8], strides = [1, 1, 1]} : vector<4x8x8xf32> to vector<1x8x8xf32>
    %148 = vector.shape_cast %147 : vector<1x8x8xf32> to vector<8x8xf32>
    %149 = tpu.concatenate %142, %144, %146, %148 in 1 : vector<8x8xf32>, vector<8x8xf32>, vector<8x8xf32>, vector<8x8xf32> -> vector<8x32xf32>
    %c1_34 = arith.constant 1 : index
    %c0_35 = arith.constant 0 : index
    %c0_36 = arith.constant 0 : index
    %c0_37 = arith.constant 0 : index
    %150 = vector.load %arg11[%c1_34, %c0_35, %c0_36, %c0_37] : memref<2x4x8x8xf32, #tpu.memory_space<vmem>>, vector<1x4x8x8xf32>
    %151 = vector.shape_cast %150 : vector<1x4x8x8xf32> to vector<4x8x8xf32>
    %152 = vector.shape_cast %139 : vector<4x8x8xf32> to vector<1x4x8x8xf32>
    tpu.vector_store %arg11[%c1_34, %c0_35, %c0_36, %c0_37], %152 {strides = array<i32>} : memref<2x4x8x8xf32, #tpu.memory_space<vmem>>, vector<1x4x8x8xf32>,
    %153 = tpu.concatenate %85, %149 in 0 : vector<8x32xf32>, vector<8x32xf32> -> vector<16x32xf32>
    %cst_38 = arith.constant dense<0.000000e+00> : vector<16x32xf32>
    %154 = tpu.matmul %153, %17, %cst_38 {dimension_numbers = #tpu.dot_dimension_numbers<[1], [0], [0], [1], [0, 0, 1, 1], [], []>} : vector<16x32xf32>, vector<32x32xf32>, vector<16x32xf32> -> vector<16x32xf32>
    %155 = arith.addf %0, %154 : vector<16x32xf32>
    %156 = vector.broadcast %4 : vector<1x32xf32> to vector<16x32xf32>
    %157 = arith.addf %155, %156 : vector<16x32xf32>
    %cst_39 = arith.constant dense<0.000000e+00> : vector<16xf32>
    %158 = vector.multi_reduction <add>, %157, %cst_39 [1] : vector<16x32xf32> to vector<16xf32>
    %159 = vector.shape_cast %158 : vector<16xf32> to vector<16x1xf32>
    %cst_40 = arith.constant 3.200000e+01 : f32
    %160 = vector.broadcast %cst_40 : f32 to vector<16x1xf32>
    %161 = arith.divf %159, %160 : vector<16x1xf32>
    %162 = vector.broadcast %161 : vector<16x1xf32> to vector<16x32xf32>
    %163 = arith.subf %157, %162 : vector<16x32xf32>
    %164 = arith.mulf %163, %163 : vector<16x32xf32>
    %cst_41 = arith.constant dense<0.000000e+00> : vector<16xf32>
    %165 = vector.multi_reduction <add>, %164, %cst_41 [1] : vector<16x32xf32> to vector<16xf32>
    %166 = vector.shape_cast %165 : vector<16xf32> to vector<16x1xf32>
    %cst_42 = arith.constant 3.200000e+01 : f32
    %167 = vector.broadcast %cst_42 : f32 to vector<16x1xf32>
    %168 = arith.divf %166, %167 : vector<16x1xf32>
    %169 = vector.broadcast %161 : vector<16x1xf32> to vector<16x32xf32>
    %170 = arith.subf %157, %169 : vector<16x32xf32>
    %cst_43 = arith.constant 9.99999974E-6 : f32
    %171 = vector.broadcast %cst_43 : f32 to vector<16x1xf32>
    %172 = arith.addf %168, %171 : vector<16x1xf32>
    %173 = math.rsqrt %172 : vector<16x1xf32>
    %174 = vector.broadcast %173 : vector<16x1xf32> to vector<16x32xf32>
    %175 = arith.mulf %170, %174 : vector<16x32xf32>
    %176 = vector.broadcast %5 : vector<1x32xf32> to vector<16x32xf32>
    %177 = arith.mulf %175, %176 : vector<16x32xf32>
    %178 = vector.broadcast %6 : vector<1x32xf32> to vector<16x32xf32>
    %179 = arith.addf %177, %178 : vector<16x32xf32>
    %cst_44 = arith.constant dense<0.000000e+00> : vector<16x32xf32>
    %180 = tpu.matmul %179, %18, %cst_44 {dimension_numbers = #tpu.dot_dimension_numbers<[1], [0], [0], [1], [0, 0, 1, 1], [], []>} : vector<16x32xf32>, vector<32x32xf32>, vector<16x32xf32> -> vector<16x32xf32>
    %181 = vector.broadcast %7 : vector<1x32xf32> to vector<16x32xf32>
    %182 = arith.addf %180, %181 : vector<16x32xf32>
    %c0_45 = arith.constant 0 : index
    %c0_46 = arith.constant 0 : index
    %183 = vector.load %arg5[%c0_45, %c0_46] : memref<32x64xf32, #tpu.memory_space<vmem>>, vector<32x64xf32>
    %cst_47 = arith.constant dense<0.000000e+00> : vector<32x64xf32>
    %184 = tpu.matmul %1, %183, %cst_47 {dimension_numbers = #tpu.dot_dimension_numbers<[1], [0], [0], [1], [0, 0, 1, 1], [], []>} : vector<32x32xf32>, vector<32x64xf32>, vector<32x64xf32> -> vector<32x64xf32>
    %185 = vector.broadcast %8 : vector<1x64xf32> to vector<32x64xf32>
    %186 = arith.addf %184, %185 : vector<32x64xf32>
    %187 = vector.extract_strided_slice %186 {offsets = [0, 0], sizes = [16, 64], strides = [1, 1]} : vector<32x64xf32> to vector<16x64xf32>
    %188 = vector.extract_strided_slice %182 {offsets = [0, 0], sizes = [8, 32], strides = [1, 1]} : vector<16x32xf32> to vector<8x32xf32>
    %189 = vector.extract_strided_slice %187 {offsets = [0, 0], sizes = [16, 32], strides = [1, 1]} : vector<16x64xf32> to vector<16x32xf32>
    %190 = vector.extract_strided_slice %187 {offsets = [0, 32], sizes = [16, 32], strides = [1, 1]} : vector<16x64xf32> to vector<16x32xf32>
    %c0_48 = arith.constant 0 : index
    %c0_49 = arith.constant 0 : index
    %c0_50 = arith.constant 0 : index
    %c0_51 = arith.constant 0 : index
    %191 = vector.load %arg3[%c0_48, %c0_49, %c0_50, %c0_51] : memref<2x1x1x16xf32, #tpu.memory_space<vmem>>, vector<1x1x1x16xf32>
    %192 = vector.shape_cast %191 : vector<1x1x1x16xf32> to vector<1x16xf32>
    %193 = vector.extract_strided_slice %188 {offsets = [0, 0], sizes = [8, 8], strides = [1, 1]} : vector<8x32xf32> to vector<8x8xf32>
    %194 = vector.extract_strided_slice %188 {offsets = [0, 8], sizes = [8, 8], strides = [1, 1]} : vector<8x32xf32> to vector<8x8xf32>
    %195 = vector.extract_strided_slice %188 {offsets = [0, 16], sizes = [8, 8], strides = [1, 1]} : vector<8x32xf32> to vector<8x8xf32>
    %196 = vector.extract_strided_slice %188 {offsets = [0, 24], sizes = [8, 8], strides = [1, 1]} : vector<8x32xf32> to vector<8x8xf32>
    %197 = vector.shape_cast %193 : vector<8x8xf32> to vector<1x8x8xf32>
    %198 = vector.shape_cast %194 : vector<8x8xf32> to vector<1x8x8xf32>
    %199 = vector.shape_cast %195 : vector<8x8xf32> to vector<1x8x8xf32>
    %200 = vector.shape_cast %196 : vector<8x8xf32> to vector<1x8x8xf32>
    %201 = tpu.concatenate %197, %198, %199, %200 in 0 : vector<1x8x8xf32>, vector<1x8x8xf32>, vector<1x8x8xf32>, vector<1x8x8xf32> -> vector<4x8x8xf32>
    %202 = vector.extract_strided_slice %189 {offsets = [0, 0], sizes = [16, 8], strides = [1, 1]} : vector<16x32xf32> to vector<16x8xf32>
    %203 = vector.extract_strided_slice %189 {offsets = [0, 8], sizes = [16, 8], strides = [1, 1]} : vector<16x32xf32> to vector<16x8xf32>
    %204 = vector.extract_strided_slice %189 {offsets = [0, 16], sizes = [16, 8], strides = [1, 1]} : vector<16x32xf32> to vector<16x8xf32>
    %205 = vector.extract_strided_slice %189 {offsets = [0, 24], sizes = [16, 8], strides = [1, 1]} : vector<16x32xf32> to vector<16x8xf32>
    %206 = vector.shape_cast %202 : vector<16x8xf32> to vector<1x16x8xf32>
    %207 = vector.shape_cast %203 : vector<16x8xf32> to vector<1x16x8xf32>
    %208 = vector.shape_cast %204 : vector<16x8xf32> to vector<1x16x8xf32>
    %209 = vector.shape_cast %205 : vector<16x8xf32> to vector<1x16x8xf32>
    %210 = tpu.concatenate %206, %207, %208, %209 in 0 : vector<1x16x8xf32>, vector<1x16x8xf32>, vector<1x16x8xf32>, vector<1x16x8xf32> -> vector<4x16x8xf32>
    %211 = vector.extract_strided_slice %190 {offsets = [0, 0], sizes = [16, 8], strides = [1, 1]} : vector<16x32xf32> to vector<16x8xf32>
    %212 = vector.extract_strided_slice %190 {offsets = [0, 8], sizes = [16, 8], strides = [1, 1]} : vector<16x32xf32> to vector<16x8xf32>
    %213 = vector.extract_strided_slice %190 {offsets = [0, 16], sizes = [16, 8], strides = [1, 1]} : vector<16x32xf32> to vector<16x8xf32>
    %214 = vector.extract_strided_slice %190 {offsets = [0, 24], sizes = [16, 8], strides = [1, 1]} : vector<16x32xf32> to vector<16x8xf32>
    %215 = vector.shape_cast %211 : vector<16x8xf32> to vector<1x16x8xf32>
    %216 = vector.shape_cast %212 : vector<16x8xf32> to vector<1x16x8xf32>
    %217 = vector.shape_cast %213 : vector<16x8xf32> to vector<1x16x8xf32>
    %218 = vector.shape_cast %214 : vector<16x8xf32> to vector<1x16x8xf32>
    %219 = tpu.concatenate %215, %216, %217, %218 in 0 : vector<1x16x8xf32>, vector<1x16x8xf32>, vector<1x16x8xf32>, vector<1x16x8xf32> -> vector<4x16x8xf32>
    "tpu.trace_start"() <{level = 10 : i32, message = "hqd,hkd->hqk"}> : () -> ()
    %cst_52 = arith.constant dense<0.000000e+00> : vector<4x8x16xf32>
    %220 = tpu.matmul %201, %210, %cst_52 {dimension_numbers = #tpu.dot_dimension_numbers<[2], [2], [1], [1], [0, 0, 0, 1, 1, 1], [0], [0]>} : vector<4x8x8xf32>, vector<4x16x8xf32>, vector<4x8x16xf32> -> vector<4x8x16xf32>
    "tpu.trace_stop"() : () -> ()
    %cst_53 = arith.constant 0.353553385 : f32
    %221 = vector.broadcast %cst_53 : f32 to vector<4x8x16xf32>
    %222 = arith.mulf %220, %221 : vector<4x8x16xf32>
    %cst_54 = arith.constant 0.000000e+00 : f32
    %223 = vector.broadcast %cst_54 : f32 to vector<1x16xf32>
    %224 = arith.cmpf oeq, %192, %223 : vector<1x16xf32>
    %cst_55 = arith.constant -1.000000e+30 : f32
    %225 = vector.shape_cast %224 : vector<1x16xi1> to vector<1x1x16xi1>
    %226 = vector.broadcast %225 : vector<1x1x16xi1> to vector<4x8x16xi1>
    %227 = vector.broadcast %cst_55 : f32 to vector<4x8x16xf32>
    %228 = arith.select %226, %227, %222 : vector<4x8x16xi1>, vector<4x8x16xf32>
    %cst_56 = arith.constant dense<0xFF800000> : vector<4x8xf32>
    %229 = vector.multi_reduction <maximumf>, %228, %cst_56 [2] : vector<4x8x16xf32> to vector<4x8xf32>
    %230 = vector.shape_cast %229 : vector<4x8xf32> to vector<4x8x1xf32>
    %231 = vector.broadcast %230 : vector<4x8x1xf32> to vector<4x8x16xf32>
    %232 = arith.subf %228, %231 : vector<4x8x16xf32>
    %233 = math.exp %232 : vector<4x8x16xf32>
    %cst_57 = arith.constant dense<0.000000e+00> : vector<4x8xf32>
    %234 = vector.multi_reduction <add>, %233, %cst_57 [2] : vector<4x8x16xf32> to vector<4x8xf32>
    %235 = vector.shape_cast %234 : vector<4x8xf32> to vector<4x8x1xf32>
    %236 = vector.broadcast %235 : vector<4x8x1xf32> to vector<4x8x16xf32>
    %237 = arith.divf %233, %236 : vector<4x8x16xf32>
    "tpu.trace_start"() <{level = 10 : i32, message = "hqk,hkd->hqd"}> : () -> ()
    %cst_58 = arith.constant dense<0.000000e+00> : vector<4x8x8xf32>
    %238 = tpu.matmul %237, %219, %cst_58 {dimension_numbers = #tpu.dot_dimension_numbers<[2], [1], [1], [2], [0, 0, 0, 1, 1, 2], [0], [0]>} : vector<4x8x16xf32>, vector<4x16x8xf32>, vector<4x8x8xf32> -> vector<4x8x8xf32>
    "tpu.trace_stop"() : () -> ()
    %239 = vector.extract_strided_slice %238 {offsets = [0, 0, 0], sizes = [1, 8, 8], strides = [1, 1, 1]} : vector<4x8x8xf32> to vector<1x8x8xf32>
    %240 = vector.shape_cast %239 : vector<1x8x8xf32> to vector<8x8xf32>
    %241 = vector.extract_strided_slice %238 {offsets = [1, 0, 0], sizes = [1, 8, 8], strides = [1, 1, 1]} : vector<4x8x8xf32> to vector<1x8x8xf32>
    %242 = vector.shape_cast %241 : vector<1x8x8xf32> to vector<8x8xf32>
    %243 = vector.extract_strided_slice %238 {offsets = [2, 0, 0], sizes = [1, 8, 8], strides = [1, 1, 1]} : vector<4x8x8xf32> to vector<1x8x8xf32>
    %244 = vector.shape_cast %243 : vector<1x8x8xf32> to vector<8x8xf32>
    %245 = vector.extract_strided_slice %238 {offsets = [3, 0, 0], sizes = [1, 8, 8], strides = [1, 1, 1]} : vector<4x8x8xf32> to vector<1x8x8xf32>
    %246 = vector.shape_cast %245 : vector<1x8x8xf32> to vector<8x8xf32>
    %247 = tpu.concatenate %240, %242, %244, %246 in 1 : vector<8x8xf32>, vector<8x8xf32>, vector<8x8xf32>, vector<8x8xf32> -> vector<8x32xf32>
    %c0_59 = arith.constant 0 : index
    %c0_60 = arith.constant 0 : index
    %c0_61 = arith.constant 0 : index
    %c0_62 = arith.constant 0 : index
    %248 = vector.load %arg10[%c0_59, %c0_60, %c0_61, %c0_62] : memref<2x4x8x16xf32, #tpu.memory_space<vmem>>, vector<1x4x8x16xf32>
    %249 = vector.shape_cast %248 : vector<1x4x8x16xf32> to vector<4x8x16xf32>
    %250 = vector.shape_cast %237 : vector<4x8x16xf32> to vector<1x4x8x16xf32>
    tpu.vector_store %arg10[%c0_59, %c0_60, %c0_61, %c0_62], %250 {strides = array<i32>} : memref<2x4x8x16xf32, #tpu.memory_space<vmem>>, vector<1x4x8x16xf32>,
    %251 = vector.extract_strided_slice %186 {offsets = [16, 0], sizes = [16, 64], strides = [1, 1]} : vector<32x64xf32> to vector<16x64xf32>
    %252 = vector.extract_strided_slice %182 {offsets = [8, 0], sizes = [8, 32], strides = [1, 1]} : vector<16x32xf32> to vector<8x32xf32>
    %253 = vector.extract_strided_slice %251 {offsets = [0, 0], sizes = [16, 32], strides = [1, 1]} : vector<16x64xf32> to vector<16x32xf32>
    %254 = vector.extract_strided_slice %251 {offsets = [0, 32], sizes = [16, 32], strides = [1, 1]} : vector<16x64xf32> to vector<16x32xf32>
    %c1_63 = arith.constant 1 : index
    %c0_64 = arith.constant 0 : index
    %c0_65 = arith.constant 0 : index
    %c0_66 = arith.constant 0 : index
    %255 = vector.load %arg3[%c1_63, %c0_64, %c0_65, %c0_66] : memref<2x1x1x16xf32, #tpu.memory_space<vmem>>, vector<1x1x1x16xf32>
    %256 = vector.shape_cast %255 : vector<1x1x1x16xf32> to vector<1x16xf32>
    %257 = vector.extract_strided_slice %252 {offsets = [0, 0], sizes = [8, 8], strides = [1, 1]} : vector<8x32xf32> to vector<8x8xf32>
    %258 = vector.extract_strided_slice %252 {offsets = [0, 8], sizes = [8, 8], strides = [1, 1]} : vector<8x32xf32> to vector<8x8xf32>
    %259 = vector.extract_strided_slice %252 {offsets = [0, 16], sizes = [8, 8], strides = [1, 1]} : vector<8x32xf32> to vector<8x8xf32>
    %260 = vector.extract_strided_slice %252 {offsets = [0, 24], sizes = [8, 8], strides = [1, 1]} : vector<8x32xf32> to vector<8x8xf32>
    %261 = vector.shape_cast %257 : vector<8x8xf32> to vector<1x8x8xf32>
    %262 = vector.shape_cast %258 : vector<8x8xf32> to vector<1x8x8xf32>
    %263 = vector.shape_cast %259 : vector<8x8xf32> to vector<1x8x8xf32>
    %264 = vector.shape_cast %260 : vector<8x8xf32> to vector<1x8x8xf32>
    %265 = tpu.concatenate %261, %262, %263, %264 in 0 : vector<1x8x8xf32>, vector<1x8x8xf32>, vector<1x8x8xf32>, vector<1x8x8xf32> -> vector<4x8x8xf32>
    %266 = vector.extract_strided_slice %253 {offsets = [0, 0], sizes = [16, 8], strides = [1, 1]} : vector<16x32xf32> to vector<16x8xf32>
    %267 = vector.extract_strided_slice %253 {offsets = [0, 8], sizes = [16, 8], strides = [1, 1]} : vector<16x32xf32> to vector<16x8xf32>
    %268 = vector.extract_strided_slice %253 {offsets = [0, 16], sizes = [16, 8], strides = [1, 1]} : vector<16x32xf32> to vector<16x8xf32>
    %269 = vector.extract_strided_slice %253 {offsets = [0, 24], sizes = [16, 8], strides = [1, 1]} : vector<16x32xf32> to vector<16x8xf32>
    %270 = vector.shape_cast %266 : vector<16x8xf32> to vector<1x16x8xf32>
    %271 = vector.shape_cast %267 : vector<16x8xf32> to vector<1x16x8xf32>
    %272 = vector.shape_cast %268 : vector<16x8xf32> to vector<1x16x8xf32>
    %273 = vector.shape_cast %269 : vector<16x8xf32> to vector<1x16x8xf32>
    %274 = tpu.concatenate %270, %271, %272, %273 in 0 : vector<1x16x8xf32>, vector<1x16x8xf32>, vector<1x16x8xf32>, vector<1x16x8xf32> -> vector<4x16x8xf32>
    %275 = vector.extract_strided_slice %254 {offsets = [0, 0], sizes = [16, 8], strides = [1, 1]} : vector<16x32xf32> to vector<16x8xf32>
    %276 = vector.extract_strided_slice %254 {offsets = [0, 8], sizes = [16, 8], strides = [1, 1]} : vector<16x32xf32> to vector<16x8xf32>
    %277 = vector.extract_strided_slice %254 {offsets = [0, 16], sizes = [16, 8], strides = [1, 1]} : vector<16x32xf32> to vector<16x8xf32>
    %278 = vector.extract_strided_slice %254 {offsets = [0, 24], sizes = [16, 8], strides = [1, 1]} : vector<16x32xf32> to vector<16x8xf32>
    %279 = vector.shape_cast %275 : vector<16x8xf32> to vector<1x16x8xf32>
    %280 = vector.shape_cast %276 : vector<16x8xf32> to vector<1x16x8xf32>
    %281 = vector.shape_cast %277 : vector<16x8xf32> to vector<1x16x8xf32>
    %282 = vector.shape_cast %278 : vector<16x8xf32> to vector<1x16x8xf32>
    %283 = tpu.concatenate %279, %280, %281, %282 in 0 : vector<1x16x8xf32>, vector<1x16x8xf32>, vector<1x16x8xf32>, vector<1x16x8xf32> -> vector<4x16x8xf32>
    "tpu.trace_start"() <{level = 10 : i32, message = "hqd,hkd->hqk"}> : () -> ()
    %cst_67 = arith.constant dense<0.000000e+00> : vector<4x8x16xf32>
    %284 = tpu.matmul %265, %274, %cst_67 {dimension_numbers = #tpu.dot_dimension_numbers<[2], [2], [1], [1], [0, 0, 0, 1, 1, 1], [0], [0]>} : vector<4x8x8xf32>, vector<4x16x8xf32>, vector<4x8x16xf32> -> vector<4x8x16xf32>
    "tpu.trace_stop"() : () -> ()
    %cst_68 = arith.constant 0.353553385 : f32
    %285 = vector.broadcast %cst_68 : f32 to vector<4x8x16xf32>
    %286 = arith.mulf %284, %285 : vector<4x8x16xf32>
    %cst_69 = arith.constant 0.000000e+00 : f32
    %287 = vector.broadcast %cst_69 : f32 to vector<1x16xf32>
    %288 = arith.cmpf oeq, %256, %287 : vector<1x16xf32>
    %cst_70 = arith.constant -1.000000e+30 : f32
    %289 = vector.shape_cast %288 : vector<1x16xi1> to vector<1x1x16xi1>
    %290 = vector.broadcast %289 : vector<1x1x16xi1> to vector<4x8x16xi1>
    %291 = vector.broadcast %cst_70 : f32 to vector<4x8x16xf32>
    %292 = arith.select %290, %291, %286 : vector<4x8x16xi1>, vector<4x8x16xf32>
    %cst_71 = arith.constant dense<0xFF800000> : vector<4x8xf32>
    %293 = vector.multi_reduction <maximumf>, %292, %cst_71 [2] : vector<4x8x16xf32> to vector<4x8xf32>
    %294 = vector.shape_cast %293 : vector<4x8xf32> to vector<4x8x1xf32>
    %295 = vector.broadcast %294 : vector<4x8x1xf32> to vector<4x8x16xf32>
    %296 = arith.subf %292, %295 : vector<4x8x16xf32>
    %297 = math.exp %296 : vector<4x8x16xf32>
    %cst_72 = arith.constant dense<0.000000e+00> : vector<4x8xf32>
    %298 = vector.multi_reduction <add>, %297, %cst_72 [2] : vector<4x8x16xf32> to vector<4x8xf32>
    %299 = vector.shape_cast %298 : vector<4x8xf32> to vector<4x8x1xf32>
    %300 = vector.broadcast %299 : vector<4x8x1xf32> to vector<4x8x16xf32>
    %301 = arith.divf %297, %300 : vector<4x8x16xf32>
    "tpu.trace_start"() <{level = 10 : i32, message = "hqk,hkd->hqd"}> : () -> ()
    %cst_73 = arith.constant dense<0.000000e+00> : vector<4x8x8xf32>
    %302 = tpu.matmul %301, %283, %cst_73 {dimension_numbers = #tpu.dot_dimension_numbers<[2], [1], [1], [2], [0, 0, 0, 1, 1, 2], [0], [0]>} : vector<4x8x16xf32>, vector<4x16x8xf32>, vector<4x8x8xf32> -> vector<4x8x8xf32>
    "tpu.trace_stop"() : () -> ()
    %303 = vector.extract_strided_slice %302 {offsets = [0, 0, 0], sizes = [1, 8, 8], strides = [1, 1, 1]} : vector<4x8x8xf32> to vector<1x8x8xf32>
    %304 = vector.shape_cast %303 : vector<1x8x8xf32> to vector<8x8xf32>
    %305 = vector.extract_strided_slice %302 {offsets = [1, 0, 0], sizes = [1, 8, 8], strides = [1, 1, 1]} : vector<4x8x8xf32> to vector<1x8x8xf32>
    %306 = vector.shape_cast %305 : vector<1x8x8xf32> to vector<8x8xf32>
    %307 = vector.extract_strided_slice %302 {offsets = [2, 0, 0], sizes = [1, 8, 8], strides = [1, 1, 1]} : vector<4x8x8xf32> to vector<1x8x8xf32>
    %308 = vector.shape_cast %307 : vector<1x8x8xf32> to vector<8x8xf32>
    %309 = vector.extract_strided_slice %302 {offsets = [3, 0, 0], sizes = [1, 8, 8], strides = [1, 1, 1]} : vector<4x8x8xf32> to vector<1x8x8xf32>
    %310 = vector.shape_cast %309 : vector<1x8x8xf32> to vector<8x8xf32>
    %311 = tpu.concatenate %304, %306, %308, %310 in 1 : vector<8x8xf32>, vector<8x8xf32>, vector<8x8xf32>, vector<8x8xf32> -> vector<8x32xf32>
    %c1_74 = arith.constant 1 : index
    %c0_75 = arith.constant 0 : index
    %c0_76 = arith.constant 0 : index
    %c0_77 = arith.constant 0 : index
    %312 = vector.load %arg10[%c1_74, %c0_75, %c0_76, %c0_77] : memref<2x4x8x16xf32, #tpu.memory_space<vmem>>, vector<1x4x8x16xf32>
    %313 = vector.shape_cast %312 : vector<1x4x8x16xf32> to vector<4x8x16xf32>
    %314 = vector.shape_cast %301 : vector<4x8x16xf32> to vector<1x4x8x16xf32>
    tpu.vector_store %arg10[%c1_74, %c0_75, %c0_76, %c0_77], %314 {strides = array<i32>} : memref<2x4x8x16xf32, #tpu.memory_space<vmem>>, vector<1x4x8x16xf32>,
    %315 = tpu.concatenate %247, %311 in 0 : vector<8x32xf32>, vector<8x32xf32> -> vector<16x32xf32>
    %cst_78 = arith.constant dense<0.000000e+00> : vector<16x32xf32>
    %316 = tpu.matmul %315, %19, %cst_78 {dimension_numbers = #tpu.dot_dimension_numbers<[1], [0], [0], [1], [0, 0, 1, 1], [], []>} : vector<16x32xf32>, vector<32x32xf32>, vector<16x32xf32> -> vector<16x32xf32>
    %317 = arith.addf %179, %316 : vector<16x32xf32>
    %318 = vector.broadcast %9 : vector<1x32xf32> to vector<16x32xf32>
    %319 = arith.addf %317, %318 : vector<16x32xf32>
    %cst_79 = arith.constant dense<0.000000e+00> : vector<16xf32>
    %320 = vector.multi_reduction <add>, %319, %cst_79 [1] : vector<16x32xf32> to vector<16xf32>
    %321 = vector.shape_cast %320 : vector<16xf32> to vector<16x1xf32>
    %cst_80 = arith.constant 3.200000e+01 : f32
    %322 = vector.broadcast %cst_80 : f32 to vector<16x1xf32>
    %323 = arith.divf %321, %322 : vector<16x1xf32>
    %324 = vector.broadcast %323 : vector<16x1xf32> to vector<16x32xf32>
    %325 = arith.subf %319, %324 : vector<16x32xf32>
    %326 = arith.mulf %325, %325 : vector<16x32xf32>
    %cst_81 = arith.constant dense<0.000000e+00> : vector<16xf32>
    %327 = vector.multi_reduction <add>, %326, %cst_81 [1] : vector<16x32xf32> to vector<16xf32>
    %328 = vector.shape_cast %327 : vector<16xf32> to vector<16x1xf32>
    %cst_82 = arith.constant 3.200000e+01 : f32
    %329 = vector.broadcast %cst_82 : f32 to vector<16x1xf32>
    %330 = arith.divf %328, %329 : vector<16x1xf32>
    %331 = vector.broadcast %323 : vector<16x1xf32> to vector<16x32xf32>
    %332 = arith.subf %319, %331 : vector<16x32xf32>
    %cst_83 = arith.constant 9.99999974E-6 : f32
    %333 = vector.broadcast %cst_83 : f32 to vector<16x1xf32>
    %334 = arith.addf %330, %333 : vector<16x1xf32>
    %335 = math.rsqrt %334 : vector<16x1xf32>
    %336 = vector.broadcast %335 : vector<16x1xf32> to vector<16x32xf32>
    %337 = arith.mulf %332, %336 : vector<16x32xf32>
    %338 = vector.broadcast %10 : vector<1x32xf32> to vector<16x32xf32>
    %339 = arith.mulf %337, %338 : vector<16x32xf32>
    %340 = vector.broadcast %11 : vector<1x32xf32> to vector<16x32xf32>
    %341 = arith.addf %339, %340 : vector<16x32xf32>
    %c0_84 = arith.constant 0 : index
    %c0_85 = arith.constant 0 : index
    %342 = vector.load %arg6[%c0_84, %c0_85] : memref<32x64xf32, #tpu.memory_space<vmem>>, vector<32x64xf32>
    %cst_86 = arith.constant dense<0.000000e+00> : vector<16x64xf32>
    %343 = tpu.matmul %341, %342, %cst_86 {dimension_numbers = #tpu.dot_dimension_numbers<[1], [0], [0], [1], [0, 0, 1, 1], [], []>} : vector<16x32xf32>, vector<32x64xf32>, vector<16x64xf32> -> vector<16x64xf32>
    %344 = vector.broadcast %12 : vector<1x64xf32> to vector<16x64xf32>
    %345 = arith.addf %343, %344 : vector<16x64xf32>
    %cst_87 = arith.constant 0.000000e+00 : f32
    %346 = vector.broadcast %cst_87 : f32 to vector<16x64xf32>
    %347 = arith.maximumf %345, %346 : vector<16x64xf32>
    %cst_88 = arith.constant dense<0.000000e+00> : vector<16x32xf32>
    %348 = tpu.matmul %347, %20, %cst_88 {dimension_numbers = #tpu.dot_dimension_numbers<[1], [0], [0], [1], [0, 0, 1, 1], [], []>} : vector<16x64xf32>, vector<64x32xf32>, vector<16x32xf32> -> vector<16x32xf32>
    %349 = vector.broadcast %13 : vector<1x32xf32> to vector<16x32xf32>
    %350 = arith.addf %348, %349 : vector<16x32xf32>
    %351 = arith.addf %341, %350 : vector<16x32xf32>
    %cst_89 = arith.constant dense<0.000000e+00> : vector<16xf32>
    %352 = vector.multi_reduction <add>, %351, %cst_89 [1] : vector<16x32xf32> to vector<16xf32>
    %353 = vector.shape_cast %352 : vector<16xf32> to vector<16x1xf32>
    %cst_90 = arith.constant 3.200000e+01 : f32
    %354 = vector.broadcast %cst_90 : f32 to vector<16x1xf32>
    %355 = arith.divf %353, %354 : vector<16x1xf32>
    %356 = vector.broadcast %355 : vector<16x1xf32> to vector<16x32xf32>
    %357 = arith.subf %351, %356 : vector<16x32xf32>
    %358 = arith.mulf %357, %357 : vector<16x32xf32>
    %cst_91 = arith.constant dense<0.000000e+00> : vector<16xf32>
    %359 = vector.multi_reduction <add>, %358, %cst_91 [1] : vector<16x32xf32> to vector<16xf32>
    %360 = vector.shape_cast %359 : vector<16xf32> to vector<16x1xf32>
    %cst_92 = arith.constant 3.200000e+01 : f32
    %361 = vector.broadcast %cst_92 : f32 to vector<16x1xf32>
    %362 = arith.divf %360, %361 : vector<16x1xf32>
    %363 = vector.broadcast %355 : vector<16x1xf32> to vector<16x32xf32>
    %364 = arith.subf %351, %363 : vector<16x32xf32>
    %cst_93 = arith.constant 9.99999974E-6 : f32
    %365 = vector.broadcast %cst_93 : f32 to vector<16x1xf32>
    %366 = arith.addf %362, %365 : vector<16x1xf32>
    %367 = math.rsqrt %366 : vector<16x1xf32>
    %368 = vector.broadcast %367 : vector<16x1xf32> to vector<16x32xf32>
    %369 = arith.mulf %364, %368 : vector<16x32xf32>
    %370 = vector.broadcast %14 : vector<1x32xf32> to vector<16x32xf32>
    %371 = arith.mulf %369, %370 : vector<16x32xf32>
    %372 = vector.broadcast %15 : vector<1x32xf32> to vector<16x32xf32>
    %373 = arith.addf %371, %372 : vector<16x32xf32>
    %c0_94 = arith.constant 0 : index
    %c0_95 = arith.constant 0 : index
    %374 = vector.load %arg9[%c0_94, %c0_95] : memref<16x32xf32, #tpu.memory_space<vmem>>, vector<16x32xf32>
    tpu.vector_store %arg9[%c0_94, %c0_95], %373 {strides = array<i32>} : memref<16x32xf32, #tpu.memory_space<vmem>>, vector<16x32xf32>,
    return
  }
}

</mosaic_0001>

<bundles_post_ra>
// kernel: tpu_custom_call.1
= control target key start
LH: loop header
LB: loop body
LE: loop exit
PB: predicated region body
PF: predicated region fallthrough
CT: control target
= control target key end

     0   :  { %17 = vsyncpa [#allocation3], 0  ;;  %s2923_s0 = inlined_call_operand.vmem [shape: f32[16,32], index: 0, kind: input, shape index: {}]   ;;  %s2924_s1 = inlined_call_operand.vmem [shape: f32[32,32], index: 1, kind: input, shape index: {}]   ;;  %s2925_s2 = inlined_call_operand.vmem [shape: f32[2,1,8,8], index: 2, kind: input, shape index: {}]   ;;  %s2926_s3 = inlined_call_operand.vmem [shape: f32[2,1,1,16], index: 3, kind: input, shape index: {}]   ;;  %s2927_s4 = inlined_call_operand.vmem [shape: f32[32,96], index: 4, kind: input, shape index: {}]   ;;  %s2928_s5 = inlined_call_operand.vmem [shape: f32[32,64], index: 5, kind: input, shape index: {}]   ;;  %s2929_s6 = inlined_call_operand.vmem [shape: f32[32,64], index: 6, kind: input, shape index: {}]   ;;  %s2930_s7 = inlined_call_operand.vmem [shape: f32[160,32], index: 7, kind: input, shape index: {}]   ;;  %s2931_s8 = inlined_call_operand.vmem [shape: f32[13,128], index: 8, kind: input, shape index: {}]   ;;  %s2932_s9 = inlined_call_operand.hbm [shape: f32[16,32], index: 9, kind: output, shape index: {0}]   ;;  %s2933_s10 = inlined_call_operand.hbm [shape: f32[2,4,8,16], index: 10, kind: output, shape index: {1}]   ;;  %s2934_s11 = inlined_call_operand.hbm [shape: f32[2,4,8,8], index: 11, kind: output, shape index: {2}]  }
   0x1   :  { %v68_v0 = vld [vmem:[%s2927_s4 + $0x18] sm:$0xff]  ;;  %v67_v1 = vld [vmem:[%s2927_s4 + $0x10] sm:$0xff]  ;;  %v66_v2 = vld [vmem:[%s2927_s4 + $0x8] sm:$0xff] }
   0x2   :  { %89 = vmatpush.msra.mxu0 %v68_v0 }
   0x3   :  { %18 = vsyncpa [#allocation5], 0  ;;  %v65_v3 = vld [vmem:[%s2927_s4] sm:$0xff]  ;;  %vm70_vm0 = vcmask 261120   ;;  %v2348_v5 = vld [vmem:[%s2923_s0 + $0x8] sm:$0xff]  ;;  %s2252_s30 = smov 112  }
   0x4   :  { %90 = vmatpush.msra.mxu0 %v67_v1  ;;  %v2341_v4 = vld [vmem:[%s2923_s0] sm:$0xff]  ;;  %s2253_s12 = smov 120   ;;  %s2254_s0 = smov 96   ;;  %vm110_vm1 = vcmask 64512  }
   0x5   :  { %v2355_v6 = vld [vmem:[%s2931_s8] sm:$0xff]  ;;  %s2255_s13 = smov 104   ;;  %s2256_s16 = smov 64  }
   0x6   :  { %91 = vmatpush.msra.mxu0 %v66_v2  ;;  %v69_v7 = vperm.slane %v2355_v6, 0  ;;  %v100_v19 = vld [vmem:[%s2925_s2] sm:$0xff]  ;;  %s2258_s19 = smov 8   ;;  %s2259_s20 = smov 24  }
   0x7   :  { %vm217_vm2 = vcmp.eq.f32.partialorder %v100_v19, 0.0  ;;  %s1920_s29 = sshll.u32 %s2933_s10, 4  ;;  %s2263_s14 = smov 128   ;;  %s1921_s29 = int_to_ptr.hbm [resolvable:$true] %s1920_s29 }
   0x8   :  { %92 = vmatpush.msra.mxu0 %v65_v3  ;;  %s2264_s15 = smov [#allocation6]   ;;  %s1933_s21 = sshll.u32 %s2934_s11, 4  ;;  %s1934_s21 = int_to_ptr.hbm [resolvable:$true] %s1933_s21 }
   0x9   :  { %1954 = vmatmul.msk.f32.vlgmr.msra.gmra.mxu0 %vm70_vm0, %v2341_v4  ;;  %s2265_s10 = smov [#allocation2]   ;;  %s1907_s22 = sshll.u32 %s2932_s9, 4  ;;  %s1908_s22 = int_to_ptr.hbm [resolvable:$true] %s1907_s22 }
   0xa   :  { %s1905_s11 = sshll.u32 %s2265_s10, 4  ;;  %s1906_s11 = int_to_ptr.vmem [resolvable:$true] %s1905_s11 }
  0x11   :  { %1955 = vmatmul.msk.f32.gmra.mxu0 %vm70_vm0, %v2348_v5 }
  0x86   :  { %v94_v8 = vpop.f32.mrf.mxu0 }
  0x87   :  { %v95_v9 = vadd.f32 %v94_v8, %v69_v7 }
  0x89   :  { %104 = vrot.lane.b32.xlu1 %v95_v9, %s2252_s30  ;;  %102 = vrot.lane.b32.xlu0 %v95_v9, %s2253_s12 }
  0x8e   :  { %v97_v14 = vpop.f32.mrf.mxu0 }
  0x8f   :  { %v2370_v15 = vadd.f32 %v97_v14, %v69_v7 }
  0x91   :  { %108 = vrot.lane.b32.xlu1 %v95_v9, %s2254_s0  ;;  %106 = vrot.lane.b32.xlu0 %v95_v9, %s2255_s13 }
  0x99   :  { %452 = vrot.lane.b32.xlu1 %v2370_v15, %s2255_s13 }
  0xfb   :  { %v2362_v10 = vpop.permute.xlu1 %104  ;;  %v103_v11 = vpop.permute.xlu0 %102 }
  0xfc   :  { %161 = vrot.lane.b32.xlu0 %v2362_v10, %s2254_s0  ;;  %135 = vrot.lane.b32.xlu2 %v103_v11, %s2254_s0 }
 0x103   :  { %v109_v12 = vpop.permute.xlu1 %108  ;;  %v107_v13 = vpop.permute.xlu0 %106 }
 0x104   :  { %1956 = vmatpush.xpose.msk.msra.mxu2 %vm110_vm1, %v109_v12  ;;  %187 = vrot.lane.b32.xlu2 %v107_v13, %s2254_s0  ;;  %v2042_v32 = vpack.i.bf16 %v103_v11, %v107_v13 }
 0x105   :  { %448 = vrot.lane.b32.xlu0 %v2370_v15, %s2253_s12 }
 0x107   :  { %1957 = vmatmul.msk.f32.vlgmr.msra.gmra.mxu2 %vm110_vm1, %v95_v9 }
 0x10b   :  { %v2396_v37 = vpop.permute.xlu1 %452 }
 0x156   :  { %v136_v16 = vpop.permute.xlu2 %135 }
 0x157   :  { %1958 = vmatpush.xpose.msk.msrb.mxu2 %vm110_vm1, %v136_v16 }
 0x15a   :  { %1959 = vmatmul.msk.f32.vlgmr.msrb.gmra.mxu2 %vm110_vm1, %v103_v11 }
 0x15e   :  { %v188_v17 = vpop.permute.xlu2 %187 }
 0x15f   :  { %1962 = vmatpush.xpose.msk.msra.mxu1 %vm110_vm1, %v188_v17 }
 0x162   :  { %1963 = vmatmul.msk.f32.vlgmr.msra.gmra.mxu1 %vm110_vm1, %v107_v13 }
 0x16e   :  { %v162_v18 = vpop.permute.xlu0 %161 }
 0x16f   :  { %1960 = vmatpush.xpose.msk.msra.mxu3 %vm110_vm1, %v162_v18 }
 0x172   :  { %1961 = vmatmul.msk.f32.vlgmr.msra.gmra.mxu3 %vm110_vm1, %v2362_v10 }
 0x177   :  { %v2401_v44 = vpop.permute.xlu0 %448 }
 0x18a   :  { %v132_v20 = vpop.f32.mrf.mxu2 }
 0x18b   :  { %v213_v21 = vmul.f32 0.35355338, %v132_v20 }
 0x18d   :  { %v220_v22 = vsel %vm217_vm2, -1e+30, %v213_v21 }
 0x18e   :  { %v224_v23 = vsel %vm110_vm1, %v220_v22, -inf }
 0x18f   :  { %225 = vmax.xlane.f32.xlu1 %v224_v23 }
 0x1a8   :  { %320 = vrot.lane.b32.xlu1 %v95_v9, %s2256_s16 }
 0x1dd   :  { %v158_v24 = vpop.f32.mrf.mxu2 }
 0x1de   :  { %v214_v25 = vmul.f32 0.35355338, %v158_v24 }
 0x1df   :  { %v210_v26 = vpop.f32.mrf.mxu1 }
 0x1e0   :  { %v216_v27 = vmul.f32 0.35355338, %v210_v26  ;;  %v221_v28 = vsel %vm217_vm2, -1e+30, %v214_v25 }
 0x1e1   :  { %v227_v29 = vsel %vm110_vm1, %v221_v28, -inf }
 0x1e2   :  { %228 = vmax.xlane.f32.xlu0 %v227_v29  ;;  %v223_v30 = vsel %vm217_vm2, -1e+30, %v216_v27 }
 0x1e3   :  { %v233_v31 = vsel %vm110_vm1, %v223_v30, -inf }
 0x1e4   :  { %234 = vmax.xlane.f32.xlu2 %v233_v31 }
 0x1f5   :  { %v184_v33 = vpop.f32.mrf.mxu3 }
 0x1f6   :  { %v215_v34 = vmul.f32 0.35355338, %v184_v33  ;;  %2043 = vrot.lane.b32.xlu0 %v2042_v32, %s2256_s16 }
 0x1f8   :  { %v222_v35 = vsel %vm217_vm2, -1e+30, %v215_v34 }
 0x1f9   :  { %v230_v36 = vsel %vm110_vm1, %v222_v35, -inf }
 0x1fa   :  { %231 = vmax.xlane.f32.xlu2 %v230_v36 }
 0x202   :  { %v226_v38 = vpop.xlane.xlu1 %225 }
 0x203   :  { %v236_v40 = vsub.f32 %v220_v22, %v226_v38 }
 0x205   :  { %v240_v41 = vmul.f32 1.442695, %v236_v40 }
 0x207   :  { %2097 = vpow2.f32 %v240_v41 }
 0x20d   :  { %v2098_v42 = vpop.eup %2097 }
 0x20e   :  { %v248_v43 = vsel %vm110_vm1, %v2098_v42, 0.0 }
 0x212   :  { %450 = vrot.lane.b32.xlu2 %v2370_v15, %s2252_s30 }
 0x21a   :  { %v321_v39 = vpop.permute.xlu1 %320 }
 0x21b   :  { %341 = vmatpush.msra.mxu2 %v321_v39 }
 0x23b   :  { %249 = vadd.xlane.f32.xlu2 %v248_v43 }
 0x255   :  { %v229_v45 = vpop.xlane.xlu0 %228 }
 0x256   :  { %v237_v46 = vsub.f32 %v221_v28, %v229_v45 }
 0x257   :  { %v235_v47 = vpop.xlane.xlu2 %234 }
 0x258   :  { %v242_v48 = vmul.f32 1.442695, %v237_v46  ;;  %v239_v49 = vsub.f32 %v223_v30, %v235_v47 }
 0x25a   :  { %2099 = vpow2.f32 %v242_v48  ;;  %v246_v50 = vmul.f32 1.442695, %v239_v49 }
 0x25c   :  { %2101 = vpow2.f32 %v246_v50 }
 0x260   :  { %v2403_v51 = vpop.eup %2099 }
 0x261   :  { %v251_v52 = vsel %vm110_vm1, %v2403_v51, 0.0 }
 0x262   :  { %v2407_v53 = vpop.eup %2101  ;;  %252 = vadd.xlane.f32.xlu0 %v251_v52 }
 0x263   :  { %v257_v54 = vsel %vm110_vm1, %v2407_v53, 0.0 }
 0x264   :  { %258 = vadd.xlane.f32.xlu1 %v257_v54 }
 0x268   :  { %v2044_v55 = vpop.permute.xlu0 %2043 }
 0x269   :  { %v2045_v56 = vunpack.i.l.bf16 %v2044_v55  ;;  %v2046_v57 = vunpack.i.h.bf16 %v2044_v55 }
 0x26b   :  { %367 = vmatpush.msrb.mxu3 %v2046_v57  ;;  %419 = vmatpush.msrb.mxu2 %v2045_v56 }
 0x26d   :  { %v232_v58 = vpop.xlane.xlu2 %231 }
 0x26e   :  { %v238_v59 = vsub.f32 %v222_v35, %v232_v58 }
 0x270   :  { %v244_v60 = vmul.f32 1.442695, %v238_v59 }
 0x272   :  { %2103 = vpow2.f32 %v244_v60 }
 0x275   :  { %v2421_v63 = vpop.permute.xlu2 %450 }
 0x276   :  { %372 = vrot.lane.b32.xlu0 %v2362_v10, %s2256_s16 }
 0x278   :  { %v2413_v61 = vpop.eup %2103 }
 0x279   :  { %v254_v62 = vsel %vm110_vm1, %v2413_v61, 0.0 }
 0x27a   :  { %255 = vadd.xlane.f32.xlu2 %v254_v62  ;;  %v1968_v62 = vld [vmem:[%s2925_s2 + $0x8] sm:$0xff]  ;;  %s2257_s2 = smov 16  }
 0x27d   :  { %454 = vrot.lane.b32.xlu1 %v2370_v15, %s2254_s0 }
 0x27e   :  { %480 = vrot.lane.b32.xlu0 %v2401_v44, %s2254_s0 }
 0x285   :  { %506 = vrot.lane.b32.xlu1 %v2421_v63, %s2254_s0 }
 0x292   :  { %532 = vrot.lane.b32.xlu2 %v2396_v37, %s2254_s0 }
 0x2ae   :  { %v250_v0 = vpop.xlane.xlu2 %249 }
 0x2af   :  { %2105 = vrcp.f32 %v250_v0  ;;  %v271_v7 = vand.u32 2147483648, %v250_v0  ;;  %v269_v9 = vand.u32 2147483647, %v250_v0  ;;  %vm265_vm4 = vweird.f32 %v250_v0 }
 0x2b1   :  { %v272_v11 = vor.u32 1.1754944e-38, %v271_v7  ;;  %vm270_vm6 = vcmp.eq.f32.partialorder %v269_v9, 8.507059e+37 }
 0x2b5   :  { %v2106_v1 = vpop.eup %2105 }
 0x2b6   :  { %v261_v2 = vmul.f32 %v2106_v1, %v250_v0  ;;  %vm266_vm3 = vweird.f32 %v2106_v1 }
 0x2b7   :  { %vm267_vm5 = vmor %vm265_vm4, %vm266_vm3 }
 0x2b8   :  { %v262_v3 = vsub.f32 1.0, %v261_v2 }
 0x2ba   :  { %v263_v8 = vmul.f32 %v2106_v1, %v262_v3 }
 0x2bc   :  { %v264_v10 = vadd.f32 %v2106_v1, %v263_v8 }
 0x2be   :  { %v268_v12 = vsel %vm267_vm5, %v2106_v1, %v264_v10  ;;  %vm562_vm5 = vcmp.eq.f32.partialorder %v1968_v62, 0.0 }
 0x2bf   :  { %v273_v13 = vsel %vm270_vm6, %v272_v11, %v268_v12 }
 0x2c0   :  { %v274_v14 = vmul.f32 %v2098_v42, %v273_v13 }
 0x2c2   :  { %1964 = vmatmul.msk.f32.vlgmr.msra.gmra.mxu2 %vm110_vm1, %v274_v14  ;;  %441 = vst.msk [vmem:[#allocation6] sm:$0xff] %vm110_vm1, %v274_v14 }
 0x2d5   :  { %v253_v16 = vpop.xlane.xlu0 %252 }
 0x2d6   :  { %2107 = vrcp.f32 %v253_v16  ;;  %v286_v23 = vand.u32 2147483648, %v253_v16  ;;  %v284_v25 = vand.u32 2147483647, %v253_v16  ;;  %vm280_vm8 = vweird.f32 %v253_v16 }
 0x2d7   :  { %v259_v17 = vpop.xlane.xlu1 %258 }
 0x2d8   :  { %2109 = vrcp.f32 %v259_v17  ;;  %v316_v27 = vand.u32 2147483648, %v259_v17  ;;  %v314_v30 = vand.u32 2147483647, %v259_v17  ;;  %v287_v31 = vor.u32 1.1754944e-38, %v286_v23 }
 0x2d9   :  { %vm285_vm11 = vcmp.eq.f32.partialorder %v284_v25, 8.507059e+37  ;;  %vm310_vm12 = vweird.f32 %v259_v17 }
 0x2da   :  { %v317_v34 = vor.u32 1.1754944e-38, %v316_v27  ;;  %vm315_vm14 = vcmp.eq.f32.partialorder %v314_v30, 8.507059e+37 }
 0x2dc   :  { %v2108_v18 = vpop.eup %2107 }
 0x2dd   :  { %v276_v19 = vmul.f32 %v2108_v18, %v253_v16  ;;  %vm281_vm7 = vweird.f32 %v2108_v18 }
 0x2de   :  { %v2110_v20 = vpop.eup %2109  ;;  %vm282_vm10 = vmor %vm280_vm8, %vm281_vm7 }
 0x2df   :  { %v277_v21 = vsub.f32 1.0, %v276_v19  ;;  %v306_v22 = vmul.f32 %v2110_v20, %v259_v17  ;;  %vm311_vm9 = vweird.f32 %v2110_v20 }
 0x2e0   :  { %vm312_vm13 = vmor %vm310_vm12, %vm311_vm9 }
 0x2e1   :  { %v278_v24 = vmul.f32 %v2108_v18, %v277_v21  ;;  %v307_v26 = vsub.f32 1.0, %v306_v22 }
 0x2e3   :  { %v279_v28 = vadd.f32 %v2108_v18, %v278_v24  ;;  %v308_v29 = vmul.f32 %v2110_v20, %v307_v26 }
 0x2e5   :  { %v309_v32 = vadd.f32 %v2110_v20, %v308_v29  ;;  %v283_v33 = vsel %vm282_vm10, %v2108_v18, %v279_v28 }
 0x2e6   :  { %v288_v35 = vsel %vm285_vm11, %v287_v31, %v283_v33 }
 0x2e7   :  { %v313_v36 = vsel %vm312_vm13, %v2110_v20, %v309_v32  ;;  %v289_v38 = vmul.f32 %v2403_v51, %v288_v35 }
 0x2e8   :  { %v318_v39 = vsel %vm315_vm14, %v317_v34, %v313_v36  ;;  %v373_v40 = vpop.permute.xlu0 %372 }
 0x2e9   :  { %1965 = vmatmul.msk.f32.vlgmr.msrb.gmra.mxu3 %vm110_vm1, %v289_v38  ;;  %442 = vst.msk [vmem:[#allocation6 + $0x8] sm:$0xff] %vm110_vm1, %v289_v38  ;;  %393 = vmatpush.msrb.mxu1 %v373_v40  ;;  %v319_v41 = vmul.f32 %v2407_v53, %v318_v39 }
 0x2eb   :  { %1967 = vmatmul.msk.f32.vlgmr.msrb.gmra.mxu2 %vm110_vm1, %v319_v41  ;;  %444 = vst.msk [vmem:[#allocation6 + $0x18] sm:$0xff] %vm110_vm1, %v319_v41 }
 0x2ed   :  { %v256_v42 = vpop.xlane.xlu2 %255 }
 0x2ee   :  { %2111 = vrcp.f32 %v256_v42  ;;  %v301_v51 = vand.u32 2147483648, %v256_v42  ;;  %v299_v53 = vand.u32 2147483647, %v256_v42  ;;  %vm295_vm2 = vweird.f32 %v256_v42 }
 0x2ef   :  { %v455_v43 = vpop.permute.xlu1 %454 }
 0x2f0   :  { %v481_v45 = vpop.permute.xlu0 %480  ;;  %1969 = vmatpush.xpose.msk.msra.mxu3 %vm110_vm1, %v455_v43  ;;  %v302_v55 = vor.u32 1.1754944e-38, %v301_v51  ;;  %vm300_vm4 = vcmp.eq.f32.partialorder %v299_v53, 8.507059e+37  ;;  %v2052_v43 = vpack.i.bf16 %v2421_v63, %v2370_v15 }
 0x2f1   :  { %1971 = vmatpush.xpose.msk.msrb.mxu0 %vm110_vm1, %v481_v45 }
 0x2f3   :  { %1970 = vmatmul.msk.f32.vlgmr.msra.gmra.mxu3 %vm110_vm1, %v2370_v15 }
 0x2f4   :  { %v2112_v46 = vpop.eup %2111  ;;  %1972 = vmatmul.msk.f32.vlgmr.msrb.gmra.mxu0 %vm110_vm1, %v2401_v44 }
 0x2f5   :  { %v291_v47 = vmul.f32 %v2112_v46, %v256_v42  ;;  %v533_v48 = vpop.permute.xlu2 %532  ;;  %vm296_vm15 = vweird.f32 %v2112_v46  ;;  %v2047_v42 = vpack.i.bf16 %v2401_v44, %v2396_v37 }
 0x2f6   :  { %1975 = vmatpush.xpose.msk.msra.mxu2 %vm110_vm1, %v533_v48  ;;  %vm297_vm3 = vmor %vm295_vm2, %vm296_vm15 }
 0x2f7   :  { %v292_v49 = vsub.f32 1.0, %v291_v47  ;;  %v507_v50 = vpop.permute.xlu1 %506 }
 0x2f8   :  { %1973 = vmatpush.xpose.msk.msra.mxu1 %vm110_vm1, %v507_v50 }
 0x2f9   :  { %v293_v52 = vmul.f32 %v2112_v46, %v292_v49  ;;  %1976 = vmatmul.msk.f32.vlgmr.msra.gmra.mxu2 %vm110_vm1, %v2396_v37 }
 0x2fb   :  { %v294_v54 = vadd.f32 %v2112_v46, %v293_v52 }
 0x2fd   :  { %v298_v56 = vsel %vm297_vm3, %v2112_v46, %v294_v54 }
 0x2fe   :  { %v303_v57 = vsel %vm300_vm4, %v302_v55, %v298_v56  ;;  %v48_v56 = vld [vmem:[%s2930_s7 + $0x18] sm:$0xff] }
 0x2ff   :  { %v304_v58 = vmul.f32 %v2413_v61, %v303_v57 }
 0x301   :  { %1966 = vmatmul.msk.f32.vlgmr.msrb.gmra.mxu1 %vm110_vm1, %v304_v58  ;;  %443 = vst.msk [vmem:[#allocation6 + $0x10] sm:$0xff] %vm110_vm1, %v304_v58 }
 0x309   :  { %1974 = vmatmul.msk.f32.vlgmr.msra.gmra.mxu1 %vm110_vm1, %v2421_v63 }
 0x345   :  { %v2450_v59 = vpop.f32.mrf.mxu2 }
 0x36c   :  { %v369_v60 = vpop.f32.mrf.mxu3 }
 0x36e   :  { %v421_v2 = vpop.f32.mrf.mxu2 }
 0x371   :  { %v503_v0 = vpop.f32.mrf.mxu0 }
 0x372   :  { %v559_v1 = vmul.f32 0.35355338, %v503_v0  ;;  %v47_v0 = vld [vmem:[%s2930_s7 + $0x10] sm:$0xff] }
 0x374   :  { %v566_v61 = vsel %vm562_vm5, -1e+30, %v559_v1 }
 0x375   :  { %v572_v3 = vsel %vm110_vm1, %v566_v61, -inf }
 0x376   :  { %573 = vmax.xlane.f32.xlu0 %v572_v3  ;;  %v477_v7 = vpop.f32.mrf.mxu3 }
 0x377   :  { %v558_v8 = vmul.f32 0.35355338, %v477_v7 }
 0x379   :  { %v565_v9 = vsel %vm562_vm5, -1e+30, %v558_v8  ;;  %v46_v8 = vld [vmem:[%s2930_s7 + $0x8] sm:$0xff] }
 0x37a   :  { %v569_v10 = vsel %vm110_vm1, %v565_v9, -inf }
 0x37b   :  { %570 = vmax.xlane.f32.xlu1 %v569_v10 }
 0x37c   :  { %v555_v11 = vpop.f32.mrf.mxu2 }
 0x37d   :  { %v561_v12 = vmul.f32 0.35355338, %v555_v11 }
 0x37e   :  { %v395_v13 = vpop.f32.mrf.mxu1 }
 0x37f   :  { %v568_v14 = vsel %vm562_vm5, -1e+30, %v561_v12  ;;  %v45_v12 = vld [vmem:[%s2930_s7] sm:$0xff] }
 0x380   :  { %v578_v16 = vsel %vm110_vm1, %v568_v14, -inf }
 0x381   :  { %579 = vmax.xlane.f32.xlu2 %v578_v16 }
 0x386   :  { %v529_v17 = vpop.f32.mrf.mxu1 }
 0x387   :  { %v560_v18 = vmul.f32 0.35355338, %v529_v17 }
 0x389   :  { %v567_v19 = vsel %vm562_vm5, -1e+30, %v560_v18 }
 0x38a   :  { %v575_v20 = vsel %vm110_vm1, %v567_v19, -inf }
 0x38b   :  { %576 = vmax.xlane.f32.xlu2 %v575_v20 }
 0x3e9   :  { %v574_v21 = vpop.xlane.xlu0 %573 }
 0x3ea   :  { %v582_v22 = vsub.f32 %v566_v61, %v574_v21 }
 0x3ec   :  { %v587_v23 = vmul.f32 1.442695, %v582_v22 }
 0x3ee   :  { %2113 = vpow2.f32 %v587_v23  ;;  %v571_v24 = vpop.xlane.xlu1 %570 }
 0x3ef   :  { %v581_v25 = vsub.f32 %v565_v9, %v571_v24 }
 0x3f1   :  { %v585_v26 = vmul.f32 1.442695, %v581_v25 }
 0x3f3   :  { %2115 = vpow2.f32 %v585_v26 }
 0x3f4   :  { %v2463_v27 = vpop.eup %2113  ;;  %v580_v28 = vpop.xlane.xlu2 %579 }
 0x3f5   :  { %v584_v29 = vsub.f32 %v568_v14, %v580_v28  ;;  %v596_v30 = vsel %vm110_vm1, %v2463_v27, 0.0 }
 0x3f6   :  { %597 = vadd.xlane.f32.xlu1 %v596_v30 }
 0x3f7   :  { %v591_v31 = vmul.f32 1.442695, %v584_v29 }
 0x3f9   :  { %v2467_v32 = vpop.eup %2115  ;;  %2117 = vpow2.f32 %v591_v31 }
 0x3fa   :  { %v593_v33 = vsel %vm110_vm1, %v2467_v32, 0.0 }
 0x3fb   :  { %594 = vadd.xlane.f32.xlu2 %v593_v33 }
 0x3fe   :  { %v577_v34 = vpop.xlane.xlu2 %576 }
 0x3ff   :  { %v2471_v35 = vpop.eup %2117  ;;  %v583_v36 = vsub.f32 %v567_v19, %v577_v34 }
 0x400   :  { %v602_v38 = vsel %vm110_vm1, %v2471_v35, 0.0 }
 0x401   :  { %v589_v39 = vmul.f32 1.442695, %v583_v36  ;;  %603 = vadd.xlane.f32.xlu0 %v602_v38 }
 0x403   :  { %2119 = vpow2.f32 %v589_v39 }
 0x409   :  { %v2475_v40 = vpop.eup %2119 }
 0x40a   :  { %v599_v41 = vsel %vm110_vm1, %v2475_v40, 0.0 }
 0x40b   :  { %600 = vadd.xlane.f32.xlu0 %v599_v41 }
 0x40f   :  { %2048 = vrot.lane.b32.xlu1 %v2047_v42, %s2256_s16 }
 0x413   :  { %2053 = vrot.lane.b32.xlu2 %v2052_v43, %s2256_s16  ;;  %s1931_s16 = sshll.u32 %s2264_s15, 4  ;;  %s1932_s16 = int_to_ptr.vmem [resolvable:$true] %s1931_s16 }
 0x417   :  { %429 = vrot.lane.b32.xlu1 %v395_v13, %s2257_s2 }
 0x41f   :  { %425 = vrot.lane.b32.xlu0 %v369_v60, %s2258_s19 }
 0x427   :  { %433 = vrot.lane.b32.xlu0 %v421_v2, %s2259_s20 }
 0x469   :  { %v598_v45 = vpop.xlane.xlu1 %597 }
 0x46a   :  { %2121 = vrcp.f32 %v598_v45  ;;  %v631_v48 = vand.u32 2147483648, %v598_v45  ;;  %v629_v50 = vand.u32 2147483647, %v598_v45  ;;  %vm625_vm7 = vweird.f32 %v598_v45 }
 0x46c   :  { %v632_v57 = vor.u32 1.1754944e-38, %v631_v48  ;;  %vm630_vm9 = vcmp.eq.f32.partialorder %v629_v50, 8.507059e+37  ;;  %v820_v50 = vperm.slane %v2355_v6, 1 }
 0x46e   :  { %v595_v46 = vpop.xlane.xlu2 %594 }
 0x46f   :  { %2123 = vrcp.f32 %v595_v46  ;;  %v616_v62 = vand.u32 2147483648, %v595_v46  ;;  %v614_v61 = vand.u32 2147483647, %v595_v46  ;;  %vm610_vm11 = vweird.f32 %v595_v46 }
 0x470   :  { %v2122_v37 = vpop.eup %2121 }
 0x471   :  { %v621_v44 = vmul.f32 %v2122_v37, %v598_v45  ;;  %vm626_vm6 = vweird.f32 %v2122_v37  ;;  %v617_v11 = vor.u32 1.1754944e-38, %v616_v62  ;;  %vm615_vm13 = vcmp.eq.f32.partialorder %v614_v61, 8.507059e+37  ;;  %v912_v62 = vld [vmem:[%s2928_s5 + $0x10] sm:$0xff]  ;;  %v39_v61 = vld [vmem:[%s2924_s1] sm:$0xff] }
 0x472   :  { %vm627_vm8 = vmor %vm625_vm7, %vm626_vm6 }
 0x473   :  { %v622_v47 = vsub.f32 1.0, %v621_v44 }
 0x474   :  { %v604_v15 = vpop.xlane.xlu0 %603 }
 0x475   :  { %v2124_v63 = vpop.eup %2123  ;;  %v623_v49 = vmul.f32 %v2122_v37, %v622_v47  ;;  %2125 = vrcp.f32 %v604_v15  ;;  %v661_v18 = vand.u32 2147483648, %v604_v15  ;;  %v659_v20 = vand.u32 2147483647, %v604_v15 }
 0x476   :  { %v606_v51 = vmul.f32 %v2124_v63, %v595_v46  ;;  %v2054_v52 = vpop.permute.xlu2 %2053  ;;  %vm611_vm10 = vweird.f32 %v2124_v63  ;;  %vm655_vm15 = vweird.f32 %v604_v15 }
 0x477   :  { %v624_v53 = vadd.f32 %v2122_v37, %v623_v49  ;;  %v2056_v54 = vunpack.i.h.bf16 %v2054_v52  ;;  %v2055_v55 = vunpack.i.l.bf16 %v2054_v52  ;;  %vm612_vm12 = vmor %vm610_vm11, %vm611_vm10  ;;  %v662_v26 = vor.u32 1.1754944e-38, %v661_v18 }
 0x478   :  { %v607_v58 = vsub.f32 1.0, %v606_v51  ;;  %vm660_vm3 = vcmp.eq.f32.partialorder %v659_v20, 8.507059e+37 }
 0x479   :  { %v628_v60 = vsel %vm627_vm8, %v2122_v37, %v624_v53  ;;  %686 = vmatpush.msrb.mxu3 %v2055_v55  ;;  %738 = vmatpush.msrb.mxu1 %v2056_v54  ;;  %vm437_vm8 = vcmask 130048  }
 0x47a   :  { %v633_v1 = vsel %vm630_vm9, %v632_v57, %v628_v60  ;;  %v608_v2 = vmul.f32 %v2124_v63, %v607_v58  ;;  %vm439_vm9 = vcmask 195584   ;;  %v2260_v60 = vmov 32.0  }
 0x47b   :  { %807 = vmatpush.msra.mxu3 %v48_v56  ;;  %v2126_v3 = vpop.eup %2125  ;;  %v634_v7 = vmul.f32 %v2463_v27, %v633_v1 }
 0x47c   :  { %v609_v9 = vadd.f32 %v2124_v63, %v608_v2  ;;  %v651_v10 = vmul.f32 %v2126_v3, %v604_v15  ;;  %vm656_vm14 = vweird.f32 %v2126_v3  ;;  %v910_v2 = vld [vmem:[%s2928_s5] sm:$0xff] }
 0x47d   :  { %808 = vmatpush.msra.mxu3 %v47_v0  ;;  %786 = vst.msk [vmem:[#allocation6 + $0x28] sm:$0xff] %vm110_vm1, %v634_v7  ;;  %vm657_vm2 = vmor %vm655_vm15, %vm656_vm14  ;;  %v911_v0 = vld [vmem:[%s2928_s5 + $0x8] sm:$0xff] }
 0x47e   :  { %v613_v13 = vsel %vm612_vm12, %v2124_v63, %v609_v9  ;;  %v652_v14 = vsub.f32 1.0, %v651_v10  ;;  %v601_v16 = vpop.xlane.xlu0 %600 }
 0x47f   :  { %809 = vmatpush.msra.mxu3 %v46_v8  ;;  %v618_v17 = vsel %vm615_vm13, %v617_v11, %v613_v13  ;;  %2127 = vrcp.f32 %v601_v16  ;;  %v646_v33 = vand.u32 2147483648, %v601_v16  ;;  %v644_v36 = vand.u32 2147483647, %v601_v16  ;;  %v40_v8 = vld [vmem:[%s2924_s1 + $0x8] sm:$0xff] }
 0x480   :  { %v653_v19 = vmul.f32 %v2126_v3, %v652_v14  ;;  %v619_v21 = vmul.f32 %v2467_v32, %v618_v17  ;;  %vm640_vm5 = vweird.f32 %v601_v16  ;;  %2129 = vrcp.f32 %v2260_v60 }
 0x481   :  { %810 = vmatpush.msra.mxu3 %v45_v12  ;;  %v2049_v22 = vpop.permute.xlu1 %2048  ;;  %v647_v39 = vor.u32 1.1754944e-38, %v646_v33  ;;  %vm645_vm7 = vcmp.eq.f32.partialorder %v644_v36, 8.507059e+37 }
 0x482   :  { %v654_v23 = vadd.f32 %v2126_v3, %v653_v19  ;;  %v2051_v24 = vunpack.i.h.bf16 %v2049_v22  ;;  %v2050_v25 = vunpack.i.l.bf16 %v2049_v22  ;;  %1977 = vmatmul.msk.f32.vlgmr.msrb.gmra.mxu3 %vm110_vm1, %v619_v21  ;;  %785 = vst.msk [vmem:[#allocation6 + $0x20] sm:$0xff] %vm110_vm1, %v619_v21  ;;  %v52_v22 = vld [vmem:[%s2930_s7 + $0x38] sm:$0xff] }
 0x484   :  { %v658_v27 = vsel %vm657_vm2, %v2126_v3, %v654_v23  ;;  %712 = vmatpush.msra.mxu0 %v2051_v24  ;;  %764 = vmatpush.msrb.mxu2 %v2050_v25  ;;  %v51_v23 = vld [vmem:[%s2930_s7 + $0x30] sm:$0xff]  ;;  %v50_v24 = vld [vmem:[%s2930_s7 + $0x28] sm:$0xff]  ;;  %v2566_v25 = vperm.slane %v2355_v6, 5 }
 0x485   :  { %v2128_v28 = vpop.eup %2127  ;;  %v663_v29 = vsel %vm660_vm3, %v662_v26, %v658_v27  ;;  %1978 = vmatmul.msk.f32.vlgmr.msra.gmra.mxu0 %vm110_vm1, %v634_v7 }
 0x486   :  { %v636_v30 = vmul.f32 %v2128_v28, %v601_v16  ;;  %v664_v31 = vmul.f32 %v2471_v35, %v663_v29  ;;  %vm641_vm4 = vweird.f32 %v2128_v28  ;;  %v2130_v1 = vpop.eup %2129  ;;  %899 = vmatpush.msrb.mxu0 %v52_v22 }
 0x487   :  { %vm642_vm6 = vmor %vm640_vm5, %vm641_vm4  ;;  %v830_v3 = vmul.f32 32.0, %v2130_v1  ;;  %vm834_vm10 = vweird.f32 %v2130_v1 }
 0x488   :  { %v637_v32 = vsub.f32 1.0, %v636_v30  ;;  %1980 = vmatmul.msk.f32.vlgmr.msrb.gmra.mxu2 %vm110_vm1, %v664_v31  ;;  %788 = vst.msk [vmem:[#allocation6 + $0x38] sm:$0xff] %vm110_vm1, %v664_v31  ;;  %900 = vmatpush.msrb.mxu0 %v51_v23 }
 0x489   :  { %v430_v46 = vpop.permute.xlu1 %429  ;;  %v831_v7 = vsub.f32 1.0, %v830_v3 }
 0x48a   :  { %v638_v34 = vmul.f32 %v2128_v28, %v637_v32  ;;  %901 = vmatpush.msrb.mxu0 %v50_v24 }
 0x48b   :  { %v832_v9 = vmul.f32 %v2130_v1, %v831_v7 }
 0x48c   :  { %v639_v38 = vadd.f32 %v2128_v28, %v638_v34 }
 0x48d   :  { %v833_v10 = vadd.f32 %v2130_v1, %v832_v9 }
 0x48e   :  { %v643_v41 = vsel %vm642_vm6, %v2128_v28, %v639_v38 }
 0x48f   :  { %v648_v42 = vsel %vm645_vm7, %v647_v39, %v643_v41  ;;  %v2547_v11 = vsel %vm834_vm10, %v2130_v1, %v833_v10 }
 0x490   :  { %v649_v43 = vmul.f32 %v2475_v40, %v648_v42  ;;  %v874_v42 = vperm.slane %v2355_v6, 2 }
 0x491   :  { %v426_v45 = vpop.permute.xlu0 %425 }
 0x492   :  { %1979 = vmatmul.msk.f32.vlgmr.msrb.gmra.mxu1 %vm110_vm1, %v649_v43  ;;  %787 = vst.msk [vmem:[#allocation6 + $0x30] sm:$0xff] %vm110_vm1, %v649_v43  ;;  %v436_v35 = vsel %vm110_vm1, %v2450_v59, %v426_v45 }
 0x493   :  { %v438_v37 = vsel %vm437_vm8, %v436_v35, %v430_v46  ;;  %v877_v35 = vperm.slane %v2355_v6, 3 }
 0x499   :  { %v434_v44 = vpop.permute.xlu0 %433 }
 0x49a   :  { %v440_v47 = vsel %vm439_vm9, %v438_v37, %v434_v44  ;;  %v41_v44 = vld [vmem:[%s2924_s1 + $0x10] sm:$0xff] }
 0x49b   :  { %1981 = vmatmul.msk.f32.vlgmr.msra.gmra.mxu3 %vm70_vm0, %v440_v47 }
 0x502   :  { %v714_v48 = vpop.f32.mrf.mxu0 }
 0x503   :  { %770 = vrot.lane.b32.xlu2 %v714_v48, %s2258_s19 }
 0x505   :  { %v688_v59 = vpop.f32.mrf.mxu3 }
 0x50b   :  { %v766_v40 = vpop.f32.mrf.mxu2 }
 0x50c   :  { %778 = vrot.lane.b32.xlu0 %v766_v40, %s2259_s20 }
 0x50f   :  { %v740_v15 = vpop.f32.mrf.mxu1 }
 0x510   :  { %774 = vrot.lane.b32.xlu1 %v740_v15, %s2257_s2 }
 0x51e   :  { %v812_v63 = vpop.f32.mrf.mxu3 }
 0x51f   :  { %v818_v49 = vadd.f32 %v812_v63, %v2341_v4  ;;  %v913_v4 = vld [vmem:[%s2928_s5 + $0x18] sm:$0xff] }
 0x520   :  { %939 = vmatpush.msra.mxu1 %v913_v4 }
 0x521   :  { %v821_v51 = vadd.f32 %v820_v50, %v818_v49 }
 0x522   :  { %940 = vmatpush.msra.mxu1 %v912_v62 }
 0x523   :  { %v823_v52 = vsel %vm70_vm0, %v821_v51, 0.0 }
 0x524   :  { %941 = vmatpush.msra.mxu1 %v911_v0 }
 0x526   :  { %942 = vmatpush.msra.mxu1 %v910_v2 }
 0x527   :  { %1985 = vmatmul.msk.f32.vlgmr.msra.gmra.mxu1 %vm70_vm0, %v39_v61 }
 0x52c   :  { %824 = vadd.xlane.f32.xlu2 %v823_v52  ;;  %v42_v52 = vld [vmem:[%s2924_s1 + $0x18] sm:$0xff] }
 0x52f   :  { %1986 = vmatmul.msk.f32.gmra.mxu1 %vm70_vm0, %v40_v8 }
 0x537   :  { %1987 = vmatmul.msk.f32.gmra.mxu1 %vm70_vm0, %v41_v44 }
 0x53f   :  { %1988 = vmatmul.msk.f32.gmra.mxu1 %vm70_vm0, %v42_v52 }
 0x55d   :  { %v771_v53 = vpop.permute.xlu2 %770 }
 0x55e   :  { %v781_v54 = vsel %vm110_vm1, %v688_v59, %v771_v53 }
 0x57e   :  { %v779_v56 = vpop.permute.xlu0 %778 }
 0x582   :  { %v775_v55 = vpop.permute.xlu1 %774 }
 0x583   :  { %v782_v57 = vsel %vm437_vm8, %v781_v54, %v775_v55  ;;  %v880_v54 = vperm.slane %v2355_v6, 4 }
 0x584   :  { %v783_v58 = vsel %vm439_vm9, %v782_v57, %v779_v56 }
 0x585   :  { %1982 = vmatmul.msk.f32.gmra.mxu3 %vm70_vm0, %v783_v58 }
 0x59f   :  { %v825_v12 = vpop.xlane.xlu2 %824 }
 0x5a0   :  { %v836_v13 = vmul.f32 %v2547_v11, %v825_v12 }
 0x5a2   :  { %v838_v14 = vsub.f32 %v821_v51, %v836_v13 }
 0x5a4   :  { %v840_v16 = vmul.f32 %v838_v14, %v838_v14  ;;  %v944_v26 = vpop.f32.mrf.mxu1 }
 0x5a5   :  { %v945_v27 = vadd.f32 %v944_v26, %v2566_v25 }
 0x5a6   :  { %v842_v17 = vsel %vm70_vm0, %v840_v16, 0.0 }
 0x5a7   :  { %843 = vadd.xlane.f32.xlu1 %v842_v17  ;;  %974 = vrot.lane.b32.xlu2 %v945_v27, %s2255_s13  ;;  %v956_v17 = vld [vmem:[%s2926_s3] sm:$0x1] }
 0x5a8   :  { %vm1086_vm3 = vcmp.eq.f32.partialorder %v956_v17, 0.0 }
 0x5ac   :  { %v947_v31 = vpop.f32.mrf.mxu1 }
 0x5ad   :  { %v948_v32 = vadd.f32 %v947_v31, %v2566_v25 }
 0x5af   :  { %1989 = vmatpush.xpose.msk.msra.mxu2 %vm110_vm1, %v948_v32  ;;  %v2057_v57 = vpack.i.bf16 %v945_v27, %v948_v32 }
 0x5b3   :  { %1990 = vmatpush.xpose.msk.msra.mxu2 %vm110_vm1, %v945_v27 }
 0x5b4   :  { %v950_v58 = vpop.f32.mrf.mxu1 }
 0x5b5   :  { %v2615_v60 = vadd.f32 %v950_v58, %v2566_v25 }
 0x5bc   :  { %v953_v23 = vpop.f32.mrf.mxu1 }
 0x5bd   :  { %v2639_v24 = vadd.f32 %v953_v23, %v2566_v25 }
 0x5c0   :  { %976 = vrot.lane.b32.xlu1 %v948_v32, %s2255_s13 }
 0x5c8   :  { %970 = vrot.lane.b32.xlu1 %v945_v27, %s2252_s30 }
 0x5d0   :  { %966 = vrot.lane.b32.xlu1 %v945_v27, %s2253_s12 }
 0x601   :  { %v975_v49 = vpop.permute.xlu2 %974 }
 0x608   :  { %v815_v18 = vpop.f32.mrf.mxu3 }
 0x609   :  { %v819_v19 = vadd.f32 %v815_v18, %v2348_v5  ;;  %v49_v5 = vld [vmem:[%s2930_s7 + $0x20] sm:$0xff] }
 0x60a   :  { %902 = vmatpush.msrb.mxu0 %v49_v5 }
 0x60b   :  { %v822_v20 = vadd.f32 %v820_v50, %v819_v19 }
 0x60d   :  { %v826_v21 = vsel %vm70_vm0, %v822_v20, 0.0 }
 0x60e   :  { %827 = vadd.xlane.f32.xlu0 %v826_v21  ;;  %v2261_v21 = vmov 0  }
 0x60f   :  { %v1087_v22 = vsel %vm1086_vm3, 1, %v2261_v21 }
 0x610   :  { %v1088_v5 = vperm.slane %v1087_v22, 0 }
 0x612   :  { %vm2646_vm4 = vcmp.eq.s32.totalorder %v1088_v5, 1 }
 0x61a   :  { %v844_v28 = vpop.xlane.xlu1 %843 }
 0x61b   :  { %v848_v29 = vmul.f32 %v844_v28, %v2547_v11 }
 0x61d   :  { %v850_v30 = vadd.f32 1e-05, %v848_v29 }
 0x61f   :  { %2131 = vrsqrt.f32 %v850_v30  ;;  %vm858_vm12 = vweird.f32 %v850_v30 }
 0x622   :  { %972 = vrot.lane.b32.xlu0 %v948_v32, %s2252_s30 }
 0x625   :  { %v2132_v33 = vpop.eup %2131 }
 0x626   :  { %v853_v34 = vmul.f32 %v2132_v33, %v850_v30  ;;  %vm859_vm11 = vweird.f32 %v2132_v33 }
 0x627   :  { %vm860_vm13 = vmor %vm858_vm12, %vm859_vm11 }
 0x628   :  { %v854_v36 = vmul.f32 %v2132_v33, %v853_v34 }
 0x62a   :  { %v855_v38 = vmul.f32 0.5, %v854_v36 }
 0x62c   :  { %v856_v39 = vsub.f32 1.5, %v855_v38 }
 0x62e   :  { %v857_v41 = vmul.f32 %v2132_v33, %v856_v39 }
 0x630   :  { %v861_v43 = vsel %vm860_vm13, %v2132_v33, %v857_v41 }
 0x631   :  { %v872_v45 = vmul.f32 %v861_v43, %v838_v14 }
 0x632   :  { %v977_v63 = vpop.permute.xlu1 %976 }
 0x633   :  { %v875_v46 = vmul.f32 %v874_v42, %v872_v45  ;;  %1998 = vmatpush.xpose.msk.msra.mxu0 %vm110_vm1, %v977_v63  ;;  %v2062_v50 = vpack.i.bf16 %v975_v49, %v977_v63 }
 0x635   :  { %v2580_v37 = vadd.f32 %v877_v35, %v875_v46  ;;  %2063 = vrot.lane.b32.xlu1 %v2062_v50, %s2254_s0 }
 0x637   :  { %1983 = vmatmul.msk.f32.vlgmr.msrb.gmra.mxu0 %vm70_vm0, %v2580_v37 }
 0x638   :  { %1999 = vmatpush.xpose.msk.msra.mxu0 %vm110_vm1, %v975_v49 }
 0x63a   :  { %v2601_v53 = vpop.permute.xlu1 %970 }
 0x642   :  { %v2629_v18 = vpop.permute.xlu1 %966 }
 0x681   :  { %v828_v47 = vpop.xlane.xlu0 %827 }
 0x682   :  { %v837_v48 = vmul.f32 %v2547_v11, %v828_v47 }
 0x684   :  { %v839_v40 = vsub.f32 %v822_v20, %v837_v48 }
 0x686   :  { %v841_v15 = vmul.f32 %v839_v40, %v839_v40 }
 0x688   :  { %v845_v59 = vsel %vm70_vm0, %v841_v15, 0.0 }
 0x689   :  { %846 = vadd.xlane.f32.xlu2 %v845_v59 }
 0x694   :  { %v2593_v51 = vpop.permute.xlu0 %972 }
 0x695   :  { %1995 = vmatpush.xpose.msk.msrb.mxu3 %vm110_vm1, %v2593_v51  ;;  %v2067_v39 = vpack.i.bf16 %v2601_v53, %v2593_v51 }
 0x699   :  { %1996 = vmatpush.xpose.msk.msrb.mxu3 %vm110_vm1, %v2601_v53 }
 0x6a7   :  { %v2064_v28 = vpop.permute.xlu1 %2063 }
 0x6a8   :  { %v2065_v33 = vunpack.i.l.bf16 %v2064_v28  ;;  %v2066_v38 = vunpack.i.h.bf16 %v2064_v28 }
 0x6b4   :  { %v904_v55 = vpop.f32.mrf.mxu0 }
 0x6b5   :  { %v905_v56 = vadd.f32 %v904_v55, %v880_v54 }
 0x6b7   :  { %1991 = vmatmul.msk.f32.vlgmr.msra.gmra.mxu2 %vm110_vm1, %v905_v56  ;;  %962 = vrot.lane.b32.xlu0 %v905_v56, %s2255_s13 }
 0x6b8   :  { %960 = vrot.lane.b32.xlu2 %v905_v56, %s2252_s30 }
 0x6bf   :  { %968 = vrot.lane.b32.xlu0 %v948_v32, %s2253_s12 }
 0x6c0   :  { %958 = vrot.lane.b32.xlu2 %v905_v56, %s2253_s12 }
 0x6c7   :  { %2058 = vrot.lane.b32.xlu0 %v2057_v57, %s2254_s0 }
 0x6c8   :  { %1346 = vrot.lane.b32.xlu2 %v2639_v24, %s2255_s13 }
 0x6cf   :  { %1344 = vrot.lane.b32.xlu0 %v2615_v60, %s2255_s13 }
 0x6d0   :  { %1338 = vrot.lane.b32.xlu2 %v2639_v24, %s2253_s12 }
 0x6fc   :  { %v847_v4 = vpop.xlane.xlu2 %846 }
 0x6fd   :  { %v849_v62 = vmul.f32 %v847_v4, %v2547_v11 }
 0x6ff   :  { %v851_v0 = vadd.f32 1e-05, %v849_v62 }
 0x701   :  { %2133 = vrsqrt.f32 %v851_v0  ;;  %vm868_vm15 = vweird.f32 %v851_v0 }
 0x707   :  { %v2134_v1 = vpop.eup %2133 }
 0x708   :  { %v863_v2 = vmul.f32 %v2134_v1, %v851_v0  ;;  %vm869_vm14 = vweird.f32 %v2134_v1 }
 0x709   :  { %vm870_vm2 = vmor %vm868_vm15, %vm869_vm14 }
 0x70a   :  { %v864_v61 = vmul.f32 %v2134_v1, %v863_v2 }
 0x70c   :  { %v865_v3 = vmul.f32 0.5, %v864_v61 }
 0x70e   :  { %v866_v7 = vsub.f32 1.5, %v865_v3 }
 0x710   :  { %v867_v8 = vmul.f32 %v2134_v1, %v866_v7 }
 0x712   :  { %v871_v9 = vsel %vm870_vm2, %v2134_v1, %v867_v8  ;;  %v961_v10 = vpop.permute.xlu2 %960 }
 0x713   :  { %1997 = vmatmul.msk.f32.vlgmr.msrb.gmra.mxu3 %vm110_vm1, %v961_v10  ;;  %v873_v12 = vmul.f32 %v871_v9, %v839_v40 }
 0x715   :  { %v876_v13 = vmul.f32 %v874_v42, %v873_v12 }
 0x717   :  { %v2621_v14 = vadd.f32 %v877_v35, %v876_v13 }
 0x719   :  { %1984 = vmatmul.msk.f32.gmra.mxu0 %vm70_vm0, %v2621_v14 }
 0x71a   :  { %v959_v26 = vpop.permute.xlu2 %958 }
 0x722   :  { %v2671_v59 = vpop.permute.xlu2 %1346 }
 0x729   :  { %v963_v16 = vpop.permute.xlu0 %962 }
 0x72a   :  { %2000 = vmatmul.msk.f32.vlgmr.msra.gmra.mxu0 %vm110_vm1, %v963_v16  ;;  %v2679_v55 = vpop.permute.xlu2 %1338 }
 0x731   :  { %v2631_v19 = vpop.permute.xlu0 %968 }
 0x732   :  { %v2072_v20 = vpack.i.bf16 %v2629_v18, %v2631_v19  ;;  %1992 = vmatpush.xpose.msk.msrb.mxu2 %vm110_vm1, %v2631_v19 }
 0x736   :  { %1993 = vmatpush.xpose.msk.msrb.mxu2 %vm110_vm1, %v2629_v18 }
 0x739   :  { %1994 = vmatmul.msk.f32.vlgmr.msrb.gmra.mxu2 %vm110_vm1, %v959_v26  ;;  %v2059_v27 = vpop.permute.xlu0 %2058 }
 0x73a   :  { %v2060_v29 = vunpack.i.l.bf16 %v2059_v27  ;;  %v1001_v30 = vpop.f32.mrf.mxu2  ;;  %v2061_v32 = vunpack.i.h.bf16 %v2059_v27 }
 0x73b   :  { %v1082_v25 = vmul.f32 0.35355338, %v1001_v30 }
 0x73c   :  { %1213 = vmatpush.msra.mxu2 %v2060_v29 }
 0x73d   :  { %v1090_v34 = vsel %vm2646_vm4, -1e+30, %v1082_v25 }
 0x73e   :  { %1214 = vmatpush.msra.mxu2 %v2061_v32  ;;  %v1094_v36 = vsel %vm437_vm8, %v1090_v34, -inf }
 0x73f   :  { %1095 = vmax.xlane.f32.xlu0 %v1094_v36 }
 0x740   :  { %1300 = vmatpush.msrb.mxu2 %v2065_v33 }
 0x741   :  { %v2667_v44 = vpop.permute.xlu0 %1344 }
 0x742   :  { %1301 = vmatpush.msrb.mxu2 %v2066_v38 }
 0x753   :  { %2068 = vrot.lane.b32.xlu0 %v2067_v39, %s2254_s0 }
 0x796   :  { %v1053_v41 = vpop.f32.mrf.mxu3  ;;  %v907_v42 = vpop.f32.mrf.mxu0 }
 0x797   :  { %v1084_v43 = vmul.f32 0.35355338, %v1053_v41  ;;  %v2660_v45 = vadd.f32 %v907_v42, %v880_v54 }
 0x799   :  { %1332 = vrot.lane.b32.xlu1 %v2660_v45, %s2255_s13  ;;  %v1092_v35 = vsel %vm2646_vm4, -1e+30, %v1084_v43 }
 0x79a   :  { %v1100_v46 = vsel %vm437_vm8, %v1092_v35, -inf }
 0x79b   :  { %1101 = vmax.xlane.f32.xlu2 %v1100_v46 }
 0x7a7   :  { %v1079_v47 = vpop.f32.mrf.mxu0 }
 0x7a8   :  { %v1085_v48 = vmul.f32 0.35355338, %v1079_v47 }
 0x7aa   :  { %v1093_v49 = vsel %vm2646_vm4, -1e+30, %v1085_v48 }
 0x7ab   :  { %v1103_v51 = vsel %vm437_vm8, %v1093_v49, -inf }
 0x7b2   :  { %v1096_v6 = vpop.xlane.xlu0 %1095 }
 0x7b3   :  { %1340 = vrot.lane.b32.xlu2 %v2615_v60, %s2252_s30  ;;  %v1106_v56 = vsub.f32 %v1090_v34, %v1096_v6 }
 0x7b5   :  { %v1110_v57 = vmul.f32 1.442695, %v1106_v56 }
 0x7b7   :  { %2135 = vpow2.f32 %v1110_v57 }
 0x7bc   :  { %v1027_v40 = vpop.f32.mrf.mxu2 }
 0x7bd   :  { %v1083_v15 = vmul.f32 0.35355338, %v1027_v40  ;;  %v2136_v58 = vpop.eup %2135 }
 0x7be   :  { %v1118_v4 = vsel %vm437_vm8, %v2136_v58, 0.0 }
 0x7bf   :  { %v1091_v63 = vsel %vm2646_vm4, -1e+30, %v1083_v15 }
 0x7c0   :  { %v1097_v50 = vsel %vm437_vm8, %v1091_v63, -inf }
 0x7c1   :  { %1098 = vmax.xlane.f32.xlu0 %v1097_v50 }
 0x7c3   :  { %1104 = vmax.xlane.f32.xlu1 %v1103_v51 }
 0x7c5   :  { %v2069_v52 = vpop.permute.xlu0 %2068 }
 0x7c6   :  { %v2070_v53 = vunpack.i.l.bf16 %v2069_v52  ;;  %v2071_v54 = vunpack.i.h.bf16 %v2069_v52 }
 0x7c8   :  { %1271 = vmatpush.msrb.mxu0 %v2070_v53 }
 0x7ca   :  { %1272 = vmatpush.msrb.mxu0 %v2071_v54 }
 0x7cc   :  { %2009 = vmatpush.xpose.msk.msra.mxu0 %vm110_vm1, %v2679_v55 }
 0x7d5   :  { %1342 = vrot.lane.b32.xlu0 %v2639_v24, %s2252_s30 }
 0x7dc   :  { %1119 = vadd.xlane.f32.xlu2 %v1118_v4  ;;  %1336 = vrot.lane.b32.xlu1 %v2615_v60, %s2253_s12 }
 0x80b   :  { %v2692_v3 = vpop.permute.xlu1 %1332 }
 0x80e   :  { %v1102_v62 = vpop.xlane.xlu2 %1101 }
 0x80f   :  { %v1108_v0 = vsub.f32 %v1092_v35, %v1102_v62 }
 0x811   :  { %v1114_v1 = vmul.f32 1.442695, %v1108_v0 }
 0x813   :  { %2137 = vpow2.f32 %v1114_v1 }
 0x816   :  { %v2704_v5 = vpop.permute.xlu2 %1340 }
 0x819   :  { %v2688_v2 = vpop.eup %2137 }
 0x81a   :  { %v1124_v61 = vsel %vm437_vm8, %v2688_v2, 0.0 }
 0x81b   :  { %1125 = vadd.xlane.f32.xlu2 %v1124_v61 }
 0x833   :  { %1330 = vrot.lane.b32.xlu2 %v2660_v45, %s2252_s30 }
 0x834   :  { %v1099_v7 = vpop.xlane.xlu0 %1098 }
 0x835   :  { %v1107_v8 = vsub.f32 %v1091_v63, %v1099_v7 }
 0x836   :  { %v1105_v9 = vpop.xlane.xlu1 %1104 }
 0x837   :  { %v1112_v10 = vmul.f32 1.442695, %v1107_v8  ;;  %v1109_v12 = vsub.f32 %v1093_v49, %v1105_v9 }
 0x839   :  { %2139 = vpow2.f32 %v1112_v10  ;;  %v1116_v13 = vmul.f32 1.442695, %v1109_v12 }
 0x83b   :  { %2141 = vpow2.f32 %v1116_v13 }
 0x83f   :  { %v2696_v16 = vpop.eup %2139 }
 0x840   :  { %v1121_v17 = vsel %vm437_vm8, %v2696_v16, 0.0 }
 0x841   :  { %v2700_v22 = vpop.eup %2141  ;;  %1122 = vadd.xlane.f32.xlu0 %v1121_v17 }
 0x842   :  { %v1127_v23 = vsel %vm437_vm8, %v2700_v22, 0.0 }
 0x843   :  { %1128 = vadd.xlane.f32.xlu1 %v1127_v23 }
 0x847   :  { %v2706_v26 = vpop.permute.xlu0 %1342 }
 0x848   :  { %2012 = vmatpush.xpose.msk.msrb.mxu1 %vm110_vm1, %v2706_v26 }
 0x84c   :  { %2013 = vmatpush.xpose.msk.msrb.mxu1 %vm110_vm1, %v2704_v5 }
 0x84e   :  { %v2712_v27 = vpop.permute.xlu1 %1336 }
 0x84f   :  { %v1120_v28 = vpop.xlane.xlu2 %1119  ;;  %2010 = vmatpush.xpose.msk.msra.mxu0 %vm110_vm1, %v2712_v27 }
 0x850   :  { %2143 = vrcp.f32 %v1120_v28  ;;  %v1141_v25 = vand.u32 2147483648, %v1120_v28  ;;  %v1139_v33 = vand.u32 2147483647, %v1120_v28  ;;  %vm1135_vm6 = vweird.f32 %v1120_v28 }
 0x852   :  { %v1142_v36 = vor.u32 1.1754944e-38, %v1141_v25  ;;  %vm1140_vm10 = vcmp.eq.f32.partialorder %v1139_v33, 8.507059e+37 }
 0x856   :  { %v2144_v29 = vpop.eup %2143 }
 0x857   :  { %v1131_v30 = vmul.f32 %v2144_v29, %v1120_v28  ;;  %vm1136_vm5 = vweird.f32 %v2144_v29 }
 0x858   :  { %vm1137_vm7 = vmor %vm1135_vm6, %vm1136_vm5 }
 0x859   :  { %v1132_v31 = vsub.f32 1.0, %v1131_v30 }
 0x85b   :  { %v1133_v32 = vmul.f32 %v2144_v29, %v1132_v31 }
 0x85c   :  { %1328 = vrot.lane.b32.xlu1 %v2660_v45, %s2253_s12 }
 0x85d   :  { %v1134_v34 = vadd.f32 %v2144_v29, %v1133_v32 }
 0x85f   :  { %v1138_v38 = vsel %vm1137_vm7, %v2144_v29, %v1134_v34 }
 0x860   :  { %v1143_v39 = vsel %vm1140_vm10, %v1142_v36, %v1138_v38 }
 0x861   :  { %v1144_v41 = vmul.f32 %v2136_v58, %v1143_v39 }
 0x863   :  { %2001 = vmatmul.msk.f32.vlgmr.msra.gmra.mxu2 %vm437_vm8, %v1144_v41  ;;  %1321 = vst.msk [vmem:[#allocation4] sm:$0xff] %vm437_vm8, %v1144_v41 }
 0x864   :  { %2015 = vmatpush.xpose.msk.msra.mxu2 %vm110_vm1, %v2671_v59  ;;  %2073 = vrot.lane.b32.xlu1 %v2072_v20, %s2254_s0 }
 0x868   :  { %2016 = vmatpush.xpose.msk.msra.mxu2 %vm110_vm1, %v2667_v44 }
 0x88e   :  { %v1126_v42 = vpop.xlane.xlu2 %1125 }
 0x88f   :  { %2145 = vrcp.f32 %v1126_v42  ;;  %v1171_v48 = vand.u32 2147483648, %v1126_v42  ;;  %v1169_v6 = vand.u32 2147483647, %v1126_v42  ;;  %vm1165_vm12 = vweird.f32 %v1126_v42 }
 0x891   :  { %v1172_v18 = vor.u32 1.1754944e-38, %v1171_v48  ;;  %vm1170_vm14 = vcmp.eq.f32.partialorder %v1169_v6, 8.507059e+37 }
 0x895   :  { %v2146_v43 = vpop.eup %2145 }
 0x896   :  { %v1161_v35 = vmul.f32 %v2146_v43, %v1126_v42  ;;  %v1331_v46 = vpop.permute.xlu2 %1330  ;;  %vm1166_vm11 = vweird.f32 %v2146_v43 }
 0x897   :  { %2014 = vmatmul.msk.f32.vlgmr.msrb.gmra.mxu1 %vm110_vm1, %v1331_v46  ;;  %vm1167_vm13 = vmor %vm1165_vm12, %vm1166_vm11 }
 0x898   :  { %v1162_v47 = vsub.f32 1.0, %v1161_v35 }
 0x89a   :  { %v1163_v40 = vmul.f32 %v2146_v43, %v1162_v47 }
 0x89c   :  { %v1164_v15 = vadd.f32 %v2146_v43, %v1163_v40 }
 0x89e   :  { %v1168_v19 = vsel %vm1167_vm13, %v2146_v43, %v1164_v15 }
 0x89f   :  { %v1173_v20 = vsel %vm1170_vm14, %v1172_v18, %v1168_v19 }
 0x8a0   :  { %v1174_v63 = vmul.f32 %v2688_v2, %v1173_v20 }
 0x8a2   :  { %2003 = vmatmul.msk.f32.vlgmr.msrb.gmra.mxu0 %vm437_vm8, %v1174_v63  ;;  %1323 = vst.msk [vmem:[#allocation4 + $0x10] sm:$0xff] %vm437_vm8, %v1174_v63 }
 0x8b4   :  { %v1123_v49 = vpop.xlane.xlu0 %1122 }
 0x8b5   :  { %2147 = vrcp.f32 %v1123_v49  ;;  %v1156_v57 = vand.u32 2147483648, %v1123_v49  ;;  %v1154_v4 = vand.u32 2147483647, %v1123_v49  ;;  %vm1150_vm2 = vweird.f32 %v1123_v49 }
 0x8b6   :  { %v1129_v50 = vpop.xlane.xlu1 %1128 }
 0x8b7   :  { %2149 = vrcp.f32 %v1129_v50  ;;  %v1186_v0 = vand.u32 2147483648, %v1129_v50  ;;  %v1184_v61 = vand.u32 2147483647, %v1129_v50  ;;  %v1157_v7 = vor.u32 1.1754944e-38, %v1156_v57 }
 0x8b8   :  { %vm1155_vm5 = vcmp.eq.f32.partialorder %v1154_v4, 8.507059e+37  ;;  %vm1180_vm6 = vweird.f32 %v1129_v50 }
 0x8b9   :  { %v1187_v12 = vor.u32 1.1754944e-38, %v1186_v0  ;;  %vm1185_vm10 = vcmp.eq.f32.partialorder %v1184_v61, 8.507059e+37  ;;  %v2077_v61 = vpack.i.bf16 %v2667_v44, %v2671_v59 }
 0x8bb   :  { %v2148_v51 = vpop.eup %2147 }
 0x8bc   :  { %v1146_v52 = vmul.f32 %v2148_v51, %v1123_v49  ;;  %vm1151_vm15 = vweird.f32 %v2148_v51 }
 0x8bd   :  { %v2150_v53 = vpop.eup %2149  ;;  %vm1152_vm4 = vmor %vm1150_vm2, %vm1151_vm15 }
 0x8be   :  { %v1147_v54 = vsub.f32 1.0, %v1146_v52  ;;  %v1176_v56 = vmul.f32 %v2150_v53, %v1129_v50  ;;  %vm1181_vm3 = vweird.f32 %v2150_v53 }
 0x8bf   :  { %vm1182_vm7 = vmor %vm1180_vm6, %vm1181_vm3 }
 0x8c0   :  { %v1148_v58 = vmul.f32 %v2148_v51, %v1147_v54  ;;  %v1177_v62 = vsub.f32 1.0, %v1176_v56 }
 0x8c2   :  { %v1149_v1 = vadd.f32 %v2148_v51, %v1148_v58  ;;  %v1178_v2 = vmul.f32 %v2150_v53, %v1177_v62 }
 0x8c4   :  { %v1153_v8 = vsel %vm1152_vm4, %v2148_v51, %v1149_v1  ;;  %v1179_v9 = vadd.f32 %v2150_v53, %v1178_v2 }
 0x8c5   :  { %v1158_v10 = vsel %vm1155_vm5, %v1157_v7, %v1153_v8  ;;  %v2092_v7 = vpack.i.bf16 %v2615_v60, %v2639_v24 }
 0x8c6   :  { %v1183_v13 = vsel %vm1182_vm7, %v2150_v53, %v1179_v9  ;;  %v1159_v17 = vmul.f32 %v2696_v16, %v1158_v10  ;;  %v2087_v53 = vpack.i.bf16 %v2704_v5, %v2712_v27  ;;  %v2082_v27 = vpack.i.bf16 %v2706_v26, %v2679_v55 }
 0x8c7   :  { %v1188_v23 = vsel %vm1185_vm10, %v1187_v12, %v1183_v13 }
 0x8c8   :  { %v1189_v28 = vmul.f32 %v2700_v22, %v1188_v23  ;;  %1322 = vst.msk [vmem:[#allocation4 + $0x8] sm:$0xff] %vm437_vm8, %v1159_v17 }
 0x8ca   :  { %2004 = vmatmul.msk.f32.vlgmr.msrb.gmra.mxu2 %vm437_vm8, %v1189_v28  ;;  %1324 = vst.msk [vmem:[#allocation4 + $0x18] sm:$0xff] %vm437_vm8, %v1189_v28 }
 0x8ce   :  { %v1329_v29 = vpop.permute.xlu1 %1328 }
 0x8cf   :  { %2011 = vmatmul.msk.f32.vlgmr.msra.gmra.mxu0 %vm110_vm1, %v1329_v29 }
 0x8d2   :  { %2017 = vmatmul.msk.f32.vlgmr.msra.gmra.mxu2 %vm110_vm1, %v2692_v3  ;;  %v2005_v3 = vld [vmem:[%s2926_s3 + $0x1] sm:$0x1] }
 0x8d3   :  { %vm1456_vm11 = vcmp.eq.f32.partialorder %v2005_v3, 0.0 }
 0x8d4   :  { %v1457_v16 = vsel %vm1456_vm11, 1, %v2261_v21 }
 0x8d5   :  { %v1458_v22 = vperm.slane %v1457_v16, 0 }
 0x8d6   :  { %v2074_v30 = vpop.permute.xlu1 %2073 }
 0x8d7   :  { %v2075_v31 = vunpack.i.l.bf16 %v2074_v30  ;;  %v2076_v25 = vunpack.i.h.bf16 %v2074_v30  ;;  %vm2751_vm12 = vcmp.eq.s32.totalorder %v1458_v22, 1 }
 0x8d9   :  { %1242 = vmatpush.msra.mxu3 %v2075_v31 }
 0x8db   :  { %1243 = vmatpush.msra.mxu3 %v2076_v25 }
 0x8dc   :  { %2002 = vmatmul.msk.f32.vlgmr.msra.gmra.mxu3 %vm437_vm8, %v1159_v17 }
 0x8dd   :  { %2006 = vmatpush.xpose.msk.msrb.mxu3 %vm110_vm1, %v2639_v24 }
 0x8e1   :  { %2007 = vmatpush.xpose.msk.msrb.mxu3 %vm110_vm1, %v2615_v60 }
 0x8e4   :  { %2008 = vmatmul.msk.f32.vlgmr.msrb.gmra.mxu3 %vm110_vm1, %v2660_v45 }
 0x8e6   :  { %v2758_v39 = vpop.f32.mrf.mxu2 }
 0x914   :  { %v1423_v32 = vpop.f32.mrf.mxu1 }
 0x915   :  { %v1454_v34 = vmul.f32 0.35355338, %v1423_v32 }
 0x917   :  { %v1462_v36 = vsel %vm2751_vm12, -1e+30, %v1454_v34 }
 0x918   :  { %v1470_v38 = vsel %vm437_vm8, %v1462_v36, -inf }
 0x919   :  { %1471 = vmax.xlane.f32.xlu0 %v1470_v38 }
 0x91f   :  { %v1274_v45 = vpop.f32.mrf.mxu0 }
 0x94c   :  { %v1397_v41 = vpop.f32.mrf.mxu0 }
 0x94d   :  { %v1453_v42 = vmul.f32 0.35355338, %v1397_v41  ;;  %v1303_v43 = vpop.f32.mrf.mxu2 }
 0x94f   :  { %v1461_v21 = vsel %vm2751_vm12, -1e+30, %v1453_v42 }
 0x950   :  { %v1467_v35 = vsel %vm437_vm8, %v1461_v21, -inf }
 0x951   :  { %1468 = vmax.xlane.f32.xlu1 %v1467_v35 }
 0x955   :  { %v1449_v46 = vpop.f32.mrf.mxu2 }
 0x956   :  { %v1455_v47 = vmul.f32 0.35355338, %v1449_v46 }
 0x958   :  { %v1463_v48 = vsel %vm2751_vm12, -1e+30, %v1455_v47 }
 0x959   :  { %v1473_v40 = vsel %vm437_vm8, %v1463_v48, -inf }
 0x95a   :  { %1474 = vmax.xlane.f32.xlu2 %v1473_v40 }
 0x95f   :  { %v1245_v6 = vpop.f32.mrf.mxu3 }
 0x967   :  { %v1371_v15 = vpop.f32.mrf.mxu3 }
 0x968   :  { %v1452_v18 = vmul.f32 0.35355338, %v1371_v15 }
 0x96a   :  { %v1460_v19 = vsel %vm2751_vm12, -1e+30, %v1452_v18 }
 0x96b   :  { %v1464_v20 = vsel %vm437_vm8, %v1460_v19, -inf }
 0x96c   :  { %1465 = vmax.xlane.f32.xlu0 %v1464_v20 }
 0x98c   :  { %v1472_v63 = vpop.xlane.xlu0 %1471 }
 0x98d   :  { %v1478_v49 = vsub.f32 %v1462_v36, %v1472_v63 }
 0x98f   :  { %v1484_v50 = vmul.f32 1.442695, %v1478_v49 }
 0x991   :  { %2151 = vpow2.f32 %v1484_v50 }
 0x997   :  { %v2152_v51 = vpop.eup %2151 }
 0x998   :  { %v1494_v52 = vsel %vm437_vm8, %v2152_v51, 0.0 }
 0x999   :  { %1495 = vadd.xlane.f32.xlu1 %v1494_v52 }
 0x9b2   :  { %2088 = vrot.lane.b32.xlu1 %v2087_v53, %s2254_s0 }
 0x9ba   :  { %1307 = vrot.lane.b32.xlu1 %v1245_v6, %s2258_s19 }
 0x9c2   :  { %1315 = vrot.lane.b32.xlu1 %v1303_v43, %s2259_s20 }
 0x9c4   :  { %v1469_v54 = vpop.xlane.xlu1 %1468 }
 0x9c5   :  { %v1477_v56 = vsub.f32 %v1461_v21, %v1469_v54 }
 0x9c7   :  { %v1482_v57 = vmul.f32 1.442695, %v1477_v56 }
 0x9c9   :  { %2153 = vpow2.f32 %v1482_v57 }
 0x9cd   :  { %v1475_v58 = vpop.xlane.xlu2 %1474 }
 0x9ce   :  { %v1479_v4 = vsub.f32 %v1463_v48, %v1475_v58 }
 0x9cf   :  { %v2154_v62 = vpop.eup %2153 }
 0x9d0   :  { %v1486_v0 = vmul.f32 1.442695, %v1479_v4  ;;  %v1491_v1 = vsel %vm437_vm8, %v2154_v62, 0.0 }
 0x9d1   :  { %1492 = vadd.xlane.f32.xlu0 %v1491_v1  ;;  %v55_v1 = vld [vmem:[%s2930_s7 + $0x50] sm:$0xff] }
 0x9d2   :  { %2155 = vpow2.f32 %v1486_v0  ;;  %v56_v0 = vld [vmem:[%s2930_s7 + $0x58] sm:$0xff] }
 0x9d8   :  { %v2776_v2 = vpop.eup %2155 }
 0x9d9   :  { %v1497_v5 = vsel %vm437_vm8, %v2776_v2, 0.0 }
 0x9da   :  { %1498 = vadd.xlane.f32.xlu2 %v1497_v5  ;;  %v53_v5 = vld [vmem:[%s2930_s7 + $0x40] sm:$0xff] }
 0x9df   :  { %v1466_v8 = vpop.xlane.xlu0 %1465 }
 0x9e0   :  { %v1476_v9 = vsub.f32 %v1460_v19, %v1466_v8 }
 0x9e2   :  { %v1480_v10 = vmul.f32 1.442695, %v1476_v9 }
 0x9e4   :  { %2157 = vpow2.f32 %v1480_v10 }
 0x9e5   :  { %2083 = vrot.lane.b32.xlu0 %v2082_v27, %s2254_s0 }
 0x9ea   :  { %v2790_v12 = vpop.eup %2157 }
 0x9eb   :  { %v1488_v44 = vsel %vm437_vm8, %v2790_v12, 0.0 }
 0x9f2   :  { %2078 = vrot.lane.b32.xlu2 %v2077_v61, %s2254_s0 }
 0x9fa   :  { %2093 = vrot.lane.b32.xlu2 %v2092_v7, %s2254_s0 }
 0xa02   :  { %1311 = vrot.lane.b32.xlu2 %v1274_v45, %s2257_s2 }
 0xa0c   :  { %v1496_v55 = vpop.xlane.xlu1 %1495 }
 0xa0d   :  { %2159 = vrcp.f32 %v1496_v55  ;;  %v1541_v60 = vand.u32 2147483648, %v1496_v55  ;;  %v1539_v17 = vand.u32 2147483647, %v1496_v55  ;;  %vm1535_vm14 = vweird.f32 %v1496_v55 }
 0xa0f   :  { %1489 = vadd.xlane.f32.xlu0 %v1488_v44  ;;  %v1542_v28 = vor.u32 1.1754944e-38, %v1541_v60  ;;  %vm1540_vm2 = vcmp.eq.f32.partialorder %v1539_v17, 8.507059e+37 }
 0xa13   :  { %v2160_v59 = vpop.eup %2159 }
 0xa14   :  { %v1531_v26 = vmul.f32 %v2160_v59, %v1496_v55  ;;  %vm1536_vm13 = vweird.f32 %v2160_v59 }
 0xa15   :  { %vm1537_vm15 = vmor %vm1535_vm14, %vm1536_vm13 }
 0xa16   :  { %v1532_v13 = vsub.f32 1.0, %v1531_v26 }
 0xa18   :  { %v1533_v24 = vmul.f32 %v2160_v59, %v1532_v13 }
 0xa1a   :  { %v1534_v23 = vadd.f32 %v2160_v59, %v1533_v24 }
 0xa1c   :  { %v1538_v29 = vsel %vm1537_vm15, %v2160_v59, %v1534_v23 }
 0xa1d   :  { %v1543_v30 = vsel %vm1540_vm2, %v1542_v28, %v1538_v29 }
 0xa1e   :  { %v1544_v31 = vmul.f32 %v2152_v51, %v1543_v30 }
 0xa20   :  { %1694 = vst.msk [vmem:[#allocation4 + $0x30] sm:$0xff] %vm437_vm8, %v1544_v31 }
 0xa24   :  { %v2089_v48 = vpop.permute.xlu1 %2088 }
 0xa25   :  { %v2091_v50 = vunpack.i.h.bf16 %v2089_v48  ;;  %v2090_v51 = vunpack.i.l.bf16 %v2089_v48 }
 0xa2c   :  { %v1308_v26 = vpop.permute.xlu1 %1307 }
 0xa2d   :  { %v1318_v23 = vsel %vm110_vm1, %v2758_v39, %v1308_v26  ;;  %v2827_v39 = vld [vmem:[%s2931_s8] sm:$0xff] }
 0xa34   :  { %v1316_v29 = vpop.permute.xlu1 %1315 }
 0xa44   :  { %v1493_v25 = vpop.xlane.xlu0 %1492 }
 0xa45   :  { %2161 = vrcp.f32 %v1493_v25  ;;  %v1526_v33 = vand.u32 2147483648, %v1493_v25  ;;  %v1524_v36 = vand.u32 2147483647, %v1493_v25  ;;  %vm1520_vm4 = vweird.f32 %v1493_v25 }
 0xa47   :  { %v1527_v45 = vor.u32 1.1754944e-38, %v1526_v33  ;;  %vm1525_vm6 = vcmp.eq.f32.partialorder %v1524_v36, 8.507059e+37 }
 0xa4b   :  { %v2162_v3 = vpop.eup %2161 }
 0xa4c   :  { %v1516_v16 = vmul.f32 %v2162_v3, %v1493_v25  ;;  %vm1521_vm3 = vweird.f32 %v2162_v3 }
 0xa4d   :  { %v1499_v22 = vpop.xlane.xlu2 %1498  ;;  %vm1522_vm5 = vmor %vm1520_vm4, %vm1521_vm3  ;;  %vm1817_vm3 = vcmask 523264  }
 0xa4e   :  { %v1517_v32 = vsub.f32 1.0, %v1516_v16  ;;  %2163 = vrcp.f32 %v1499_v22  ;;  %v1556_v15 = vand.u32 2147483648, %v1499_v22  ;;  %v1554_v63 = vand.u32 2147483647, %v1499_v22 }
 0xa4f   :  { %vm1550_vm10 = vweird.f32 %v1499_v22  ;;  %v1727_v16 = vperm.slane %v2827_v39, 6 }
 0xa50   :  { %v1518_v34 = vmul.f32 %v2162_v3, %v1517_v32  ;;  %v1557_v53 = vor.u32 1.1754944e-38, %v1556_v15  ;;  %vm1555_vm12 = vcmp.eq.f32.partialorder %v1554_v63, 8.507059e+37 }
 0xa52   :  { %v1519_v38 = vadd.f32 %v2162_v3, %v1518_v34 }
 0xa54   :  { %v2164_v41 = vpop.eup %2163  ;;  %v1523_v42 = vsel %vm1522_vm5, %v2162_v3, %v1519_v38 }
 0xa55   :  { %v1528_v43 = vsel %vm1525_vm6, %v1527_v45, %v1523_v42  ;;  %v1546_v21 = vmul.f32 %v2164_v41, %v1499_v22  ;;  %v2079_v35 = vpop.permute.xlu2 %2078  ;;  %vm1551_vm7 = vweird.f32 %v2164_v41 }
 0xa56   :  { %v2080_v46 = vunpack.i.l.bf16 %v2079_v35  ;;  %v1529_v47 = vmul.f32 %v2154_v62, %v1528_v43  ;;  %v2081_v49 = vunpack.i.h.bf16 %v2079_v35  ;;  %vm1552_vm11 = vmor %vm1550_vm10, %vm1551_vm7 }
 0xa57   :  { %v1547_v40 = vsub.f32 1.0, %v1546_v21  ;;  %v2084_v6 = vpop.permute.xlu0 %2083 }
 0xa58   :  { %v2086_v18 = vunpack.i.h.bf16 %v2084_v6  ;;  %v2085_v19 = vunpack.i.l.bf16 %v2084_v6  ;;  %1670 = vmatpush.msrb.mxu2 %v2080_v46  ;;  %1693 = vst.msk [vmem:[#allocation4 + $0x28] sm:$0xff] %vm437_vm8, %v1529_v47 }
 0xa59   :  { %v1548_v20 = vmul.f32 %v2164_v41, %v1547_v40 }
 0xa5a   :  { %1612 = vmatpush.msrb.mxu0 %v2085_v19  ;;  %1641 = vmatpush.msra.mxu1 %v2086_v18  ;;  %v1783_v18 = vld [vmem:[%s2929_s6 + $0x18] sm:$0xff]  ;;  %v1782_v19 = vld [vmem:[%s2929_s6 + $0x10] sm:$0xff] }
 0xa5b   :  { %v1549_v52 = vadd.f32 %v2164_v41, %v1548_v20  ;;  %1671 = vmatpush.msrb.mxu2 %v2081_v49  ;;  %v1781_v20 = vld [vmem:[%s2929_s6 + $0x8] sm:$0xff] }
 0xa5c   :  { %1613 = vmatpush.msrb.mxu0 %v2090_v51  ;;  %1642 = vmatpush.msra.mxu1 %v2091_v50 }
 0xa5d   :  { %v1553_v54 = vsel %vm1552_vm11, %v2164_v41, %v1549_v52  ;;  %2019 = vmatmul.msk.f32.vlgmr.msrb.gmra.mxu0 %vm437_vm8, %v1529_v47  ;;  %2020 = vmatmul.msk.f32.vlgmr.msra.gmra.mxu1 %vm437_vm8, %v1544_v31  ;;  %v2094_v56 = vpop.permute.xlu2 %2093 }
 0xa5e   :  { %v1558_v57 = vsel %vm1555_vm12, %v1557_v53, %v1553_v54  ;;  %v2095_v58 = vunpack.i.l.bf16 %v2094_v56  ;;  %v2096_v62 = vunpack.i.h.bf16 %v2094_v56  ;;  %1803 = vmatpush.msra.mxu0 %v1783_v18 }
 0xa5f   :  { %v1559_v4 = vmul.f32 %v2776_v2, %v1558_v57  ;;  %v54_v2 = vld [vmem:[%s2930_s7 + $0x48] sm:$0xff] }
 0xa60   :  { %1583 = vmatpush.msra.mxu3 %v2095_v58  ;;  %1804 = vmatpush.msra.mxu0 %v1782_v19  ;;  %v2856_v58 = vld [vmem:[%s2931_s8 + $0x8] sm:$0x1f] }
 0xa61   :  { %2021 = vmatmul.msk.f32.vlgmr.msrb.gmra.mxu2 %vm437_vm8, %v1559_v4  ;;  %1695 = vst.msk [vmem:[#allocation4 + $0x38] sm:$0xff] %vm437_vm8, %v1559_v4  ;;  %v1774_v4 = vperm.slane %v2827_v39, 7 }
 0xa62   :  { %1584 = vmatpush.msra.mxu3 %v2096_v62  ;;  %1805 = vmatpush.msra.mxu0 %v1781_v20 }
 0xa64   :  { %1714 = vmatpush.msrb.mxu3 %v56_v0 }
 0xa65   :  { %v1312_v17 = vpop.permute.xlu2 %1311 }
 0xa66   :  { %1715 = vmatpush.msrb.mxu3 %v55_v1  ;;  %v1319_v28 = vsel %vm437_vm8, %v1318_v23, %v1312_v17  ;;  %v1777_v1 = vperm.slane %v2856_v58, 0  ;;  %v1784_v17 = vperm.slane %v2856_v58, 1 }
 0xa67   :  { %v1320_v30 = vsel %vm439_vm9, %v1319_v28, %v1316_v29 }
 0xa68   :  { %1716 = vmatpush.msrb.mxu3 %v54_v2 }
 0xa6a   :  { %1717 = vmatpush.msrb.mxu3 %v53_v5 }
 0xa82   :  { %v1490_v27 = vpop.xlane.xlu0 %1489 }
 0xa83   :  { %2165 = vrcp.f32 %v1490_v27  ;;  %v1511_v9 = vand.u32 2147483648, %v1490_v27  ;;  %v1509_v55 = vand.u32 2147483647, %v1490_v27  ;;  %vm1505_vm14 = vweird.f32 %v1490_v27 }
 0xa85   :  { %v1512_v59 = vor.u32 1.1754944e-38, %v1511_v9  ;;  %vm1510_vm2 = vcmp.eq.f32.partialorder %v1509_v55, 8.507059e+37  ;;  %v60_v9 = vld [vmem:[%s2930_s7 + $0x78] sm:$0xff] }
 0xa89   :  { %v2166_v61 = vpop.eup %2165 }
 0xa8a   :  { %v1501_v7 = vmul.f32 %v2166_v61, %v1490_v27  ;;  %vm1506_vm13 = vweird.f32 %v2166_v61  ;;  %v64_v27 = vld [vmem:[%s2930_s7 + $0x98] sm:$0xff] }
 0xa8b   :  { %vm1507_vm15 = vmor %vm1505_vm14, %vm1506_vm13  ;;  %1832 = vmatpush.msrb.mxu1 %v64_v27 }
 0xa8c   :  { %v1502_v8 = vsub.f32 1.0, %v1501_v7  ;;  %v62_v7 = vld [vmem:[%s2930_s7 + $0x88] sm:$0xff] }
 0xa8e   :  { %v1503_v10 = vmul.f32 %v2166_v61, %v1502_v8  ;;  %v61_v8 = vld [vmem:[%s2930_s7 + $0x80] sm:$0xff] }
 0xa90   :  { %v1504_v44 = vadd.f32 %v2166_v61, %v1503_v10 }
 0xa92   :  { %v1508_v13 = vsel %vm1507_vm15, %v2166_v61, %v1504_v44  ;;  %v63_v61 = vld [vmem:[%s2930_s7 + $0x90] sm:$0xff] }
 0xa93   :  { %v1513_v60 = vsel %vm1510_vm2, %v1512_v59, %v1508_v13  ;;  %1833 = vmatpush.msrb.mxu1 %v63_v61  ;;  %v59_v13 = vld [vmem:[%s2930_s7 + $0x70] sm:$0xff] }
 0xa94   :  { %v1514_v24 = vmul.f32 %v2790_v12, %v1513_v60  ;;  %v58_v60 = vld [vmem:[%s2930_s7 + $0x68] sm:$0xff] }
 0xa95   :  { %1834 = vmatpush.msrb.mxu1 %v62_v7 }
 0xa96   :  { %2018 = vmatmul.msk.f32.vlgmr.msra.gmra.mxu3 %vm437_vm8, %v1514_v24  ;;  %1692 = vst.msk [vmem:[#allocation4 + $0x20] sm:$0xff] %vm437_vm8, %v1514_v24  ;;  %v57_v24 = vld [vmem:[%s2930_s7 + $0x60] sm:$0xff]  ;;  %s2262_s7 = smov [#allocation4]  }
 0xa97   :  { %1835 = vmatpush.msrb.mxu1 %v61_v8 }
 0xa99   :  { %1836 = vmatpush.msrb.mxu1 %v60_v9 }
 0xa9b   :  { %1837 = vmatpush.msrb.mxu1 %v59_v13 }
 0xa9d   :  { %1838 = vmatpush.msrb.mxu1 %v58_v60 }
 0xa9e   :  { %2022 = vmatmul.msk.f32.vlgmr.msrb.gmra.mxu3 %vm70_vm0, %v1320_v30 }
 0xa9f   :  { %1839 = vmatpush.msrb.mxu1 %v57_v24 }
 0xada   :  { %v1615_v31 = vpop.f32.mrf.mxu0  ;;  %v1644_v25 = vpop.f32.mrf.mxu1 }
 0xadb   :  { %1681 = vrot.lane.b32.xlu1 %v1644_v25, %s2257_s2  ;;  %1677 = vrot.lane.b32.xlu2 %v1615_v31, %s2258_s19  ;;  %s1918_s2 = sshll.u32 %s2262_s7, 4  ;;  %s1919_s2 = int_to_ptr.vmem [resolvable:$true] %s1918_s2 }
 0xadc   :  { %1926 = dma.vmem_to_hbm [thread:$0]  %s1919_s2, 1024, %s1921_s29, [#allocation5], %s2263_s14, %s2263_s14, %s2258_s19  }
 0xadd   :  { %1939 = dma.vmem_to_hbm [thread:$0]  %s1932_s16, 1024, %s1934_s21, [#allocation5], %s2263_s14, %s2263_s14, %s2258_s19  }
 0xae4   :  { %v1673_v12 = vpop.f32.mrf.mxu2 }
 0xae5   :  { %1685 = vrot.lane.b32.xlu2 %v1673_v12, %s2259_s20 }
 0xb19   :  { %v1586_v3 = vpop.f32.mrf.mxu3 }
 0xb21   :  { %v1719_v22 = vpop.f32.mrf.mxu3 }
 0xb22   :  { %v1725_v32 = vadd.f32 %v1719_v22, %v2580_v37 }
 0xb24   :  { %v1728_v33 = vadd.f32 %v1727_v16, %v1725_v32 }
 0xb26   :  { %v1730_v34 = vsel %vm70_vm0, %v1728_v33, 0.0 }
 0xb27   :  { %1731 = vadd.xlane.f32.xlu1 %v1730_v34 }
 0xb35   :  { %v1678_v36 = vpop.permute.xlu2 %1677 }
 0xb36   :  { %v1688_v38 = vsel %vm110_vm1, %v1586_v3, %v1678_v36 }
 0xb3f   :  { %v1686_v41 = vpop.permute.xlu2 %1685 }
 0xb4d   :  { %v1682_v45 = vpop.permute.xlu1 %1681 }
 0xb4e   :  { %v1689_v42 = vsel %vm437_vm8, %v1688_v38, %v1682_v45  ;;  %v1816_v45 = vperm.slane %v2856_v58, 2 }
 0xb4f   :  { %v1690_v43 = vsel %vm439_vm9, %v1689_v42, %v1686_v41 }
 0xb50   :  { %2023 = vmatmul.msk.f32.gmra.mxu3 %vm70_vm0, %v1690_v43 }
 0xb9a   :  { %v1732_v21 = vpop.xlane.xlu1 %1731 }
 0xb9b   :  { %v1736_v35 = vmul.f32 %v1732_v21, %v2547_v11 }
 0xb9d   :  { %v1738_v46 = vsub.f32 %v1728_v33, %v1736_v35 }
 0xb9f   :  { %v1740_v37 = vmul.f32 %v1738_v46, %v1738_v46 }
 0xba1   :  { %v1742_v47 = vsel %vm70_vm0, %v1740_v37, 0.0 }
 0xba2   :  { %1743 = vadd.xlane.f32.xlu0 %v1742_v47 }
 0xbd3   :  { %v1722_v48 = vpop.f32.mrf.mxu3 }
 0xbd4   :  { %v1726_v40 = vadd.f32 %v1722_v48, %v2621_v14  ;;  %v1780_v14 = vld [vmem:[%s2929_s6] sm:$0xff] }
 0xbd5   :  { %1806 = vmatpush.msra.mxu0 %v1780_v14 }
 0xbd6   :  { %v1729_v6 = vadd.f32 %v1727_v16, %v1726_v40 }
 0xbd8   :  { %v1733_v15 = vsel %vm70_vm0, %v1729_v6, 0.0 }
 0xbd9   :  { %1734 = vadd.xlane.f32.xlu2 %v1733_v15 }
 0xc15   :  { %v1744_v63 = vpop.xlane.xlu0 %1743 }
 0xc16   :  { %v1748_v49 = vmul.f32 %v1744_v63, %v2547_v11 }
 0xc18   :  { %v1750_v50 = vadd.f32 1e-05, %v1748_v49 }
 0xc1a   :  { %2167 = vrsqrt.f32 %v1750_v50  ;;  %vm1758_vm8 = vweird.f32 %v1750_v50 }
 0xc20   :  { %v2168_v51 = vpop.eup %2167 }
 0xc21   :  { %v1753_v52 = vmul.f32 %v2168_v51, %v1750_v50  ;;  %vm1759_vm1 = vweird.f32 %v2168_v51 }
 0xc22   :  { %vm1760_vm9 = vmor %vm1758_vm8, %vm1759_vm1 }
 0xc23   :  { %v1754_v53 = vmul.f32 %v2168_v51, %v1753_v52 }
 0xc25   :  { %v1755_v54 = vmul.f32 0.5, %v1754_v53 }
 0xc27   :  { %v1756_v56 = vsub.f32 1.5, %v1755_v54 }
 0xc29   :  { %v1757_v57 = vmul.f32 %v2168_v51, %v1756_v56 }
 0xc2b   :  { %v1761_v62 = vsel %vm1760_vm9, %v2168_v51, %v1757_v57 }
 0xc2c   :  { %v1772_v0 = vmul.f32 %v1761_v62, %v1738_v46 }
 0xc2e   :  { %v1775_v2 = vmul.f32 %v1774_v4, %v1772_v0 }
 0xc30   :  { %v1778_v5 = vadd.f32 %v1777_v1, %v1775_v2 }
 0xc32   :  { %2024 = vmatmul.msk.f32.vlgmr.msra.gmra.mxu0 %vm70_vm0, %v1778_v5 }
 0xc4c   :  { %v1735_v10 = vpop.xlane.xlu2 %1734 }
 0xc4d   :  { %v1737_v55 = vmul.f32 %v1735_v10, %v2547_v11 }
 0xc4f   :  { %v1739_v44 = vsub.f32 %v1729_v6, %v1737_v55 }
 0xc51   :  { %v1741_v59 = vmul.f32 %v1739_v44, %v1739_v44 }
 0xc53   :  { %v1745_v26 = vsel %vm70_vm0, %v1741_v59, 0.0 }
 0xc54   :  { %1746 = vadd.xlane.f32.xlu0 %v1745_v26 }
 0xcaf   :  { %v1808_v23 = vpop.f32.mrf.mxu0 }
 0xcb0   :  { %v1809_v28 = vadd.f32 %v1808_v23, %v1784_v17 }
 0xcb2   :  { %v1814_v29 = vmax.f32 %v1809_v28, 0.0 }
 0xcb4   :  { %2026 = vmatmul.msk.f32.vlgmr.msrb.gmra.mxu1 %vm1817_vm3, %v1814_v29 }
 0xcc7   :  { %v1747_v30 = vpop.xlane.xlu0 %1746 }
 0xcc8   :  { %v1749_v31 = vmul.f32 %v1747_v30, %v2547_v11 }
 0xcca   :  { %v1751_v25 = vadd.f32 1e-05, %v1749_v31 }
 0xccc   :  { %2169 = vrsqrt.f32 %v1751_v25  ;;  %vm1768_vm5 = vweird.f32 %v1751_v25 }
 0xcd2   :  { %v2170_v12 = vpop.eup %2169 }
 0xcd3   :  { %v1763_v3 = vmul.f32 %v2170_v12, %v1751_v25  ;;  %vm1769_vm4 = vweird.f32 %v2170_v12 }
 0xcd4   :  { %vm1770_vm6 = vmor %vm1768_vm5, %vm1769_vm4 }
 0xcd5   :  { %v1764_v39 = vmul.f32 %v2170_v12, %v1763_v3 }
 0xcd7   :  { %v1765_v16 = vmul.f32 0.5, %v1764_v39 }
 0xcd9   :  { %v1766_v22 = vsub.f32 1.5, %v1765_v16 }
 0xcdb   :  { %v1767_v32 = vmul.f32 %v2170_v12, %v1766_v22 }
 0xcdd   :  { %v1771_v33 = vsel %vm1770_vm6, %v2170_v12, %v1767_v32 }
 0xcde   :  { %v1773_v34 = vmul.f32 %v1771_v33, %v1739_v44 }
 0xce0   :  { %v1776_v36 = vmul.f32 %v1774_v4, %v1773_v34  ;;  %v1893_v4 = vperm.slane %v2856_v58, 3 }
 0xce2   :  { %v1779_v38 = vadd.f32 %v1777_v1, %v1776_v36  ;;  %v1896_v1 = vperm.slane %v2856_v58, 4 }
 0xce4   :  { %2025 = vmatmul.msk.f32.gmra.mxu0 %vm70_vm0, %v1779_v38 }
 0xd31   :  { %v1841_v41 = vpop.f32.mrf.mxu1 }
 0xd32   :  { %v1842_v42 = vadd.f32 %v1841_v41, %v1816_v45 }
 0xd34   :  { %v1847_v43 = vadd.f32 %v1842_v42, %v1778_v5 }
 0xd36   :  { %v1849_v21 = vsel %vm70_vm0, %v1847_v43, 0.0 }
 0xd37   :  { %1850 = vadd.xlane.f32.xlu0 %v1849_v21 }
 0xd61   :  { %v1811_v35 = vpop.f32.mrf.mxu0 }
 0xd62   :  { %v1812_v46 = vadd.f32 %v1811_v35, %v1784_v17 }
 0xd64   :  { %v1815_v37 = vmax.f32 %v1812_v46, 0.0 }
 0xd66   :  { %2027 = vmatmul.msk.f32.gmra.mxu1 %vm1817_vm3, %v1815_v37 }
 0xdaa   :  { %v1851_v47 = vpop.xlane.xlu0 %1850 }
 0xdab   :  { %v1855_v48 = vmul.f32 %v1851_v47, %v2547_v11 }
 0xdad   :  { %v1857_v40 = vsub.f32 %v1847_v43, %v1855_v48 }
 0xdaf   :  { %v1859_v6 = vmul.f32 %v1857_v40, %v1857_v40 }
 0xdb1   :  { %v1861_v15 = vsel %vm70_vm0, %v1859_v6, 0.0 }
 0xdb2   :  { %1862 = vadd.xlane.f32.xlu1 %v1861_v15 }
 0xde3   :  { %v1844_v18 = vpop.f32.mrf.mxu1 }
 0xde4   :  { %v1845_v19 = vadd.f32 %v1844_v18, %v1816_v45 }
 0xde6   :  { %v1848_v20 = vadd.f32 %v1845_v19, %v1779_v38 }
 0xde8   :  { %v1852_v14 = vsel %vm70_vm0, %v1848_v20, 0.0 }
 0xde9   :  { %1853 = vadd.xlane.f32.xlu0 %v1852_v14 }
 0xe25   :  { %v1863_v63 = vpop.xlane.xlu1 %1862 }
 0xe26   :  { %v1867_v49 = vmul.f32 %v1863_v63, %v2547_v11 }
 0xe28   :  { %v1869_v50 = vadd.f32 1e-05, %v1867_v49 }
 0xe2a   :  { %2171 = vrsqrt.f32 %v1869_v50  ;;  %vm1877_vm10 = vweird.f32 %v1869_v50 }
 0xe30   :  { %v2172_v51 = vpop.eup %2171 }
 0xe31   :  { %v1872_v52 = vmul.f32 %v2172_v51, %v1869_v50  ;;  %vm1878_vm7 = vweird.f32 %v2172_v51 }
 0xe32   :  { %vm1879_vm11 = vmor %vm1877_vm10, %vm1878_vm7 }
 0xe33   :  { %v1873_v53 = vmul.f32 %v2172_v51, %v1872_v52 }
 0xe35   :  { %v1874_v54 = vmul.f32 0.5, %v1873_v53 }
 0xe37   :  { %v1875_v56 = vsub.f32 1.5, %v1874_v54 }
 0xe39   :  { %v1876_v57 = vmul.f32 %v2172_v51, %v1875_v56 }
 0xe3b   :  { %v1880_v62 = vsel %vm1879_vm11, %v2172_v51, %v1876_v57 }
 0xe3c   :  { %v1891_v0 = vmul.f32 %v1880_v62, %v1857_v40 }
 0xe3e   :  { %v1894_v2 = vmul.f32 %v1893_v4, %v1891_v0 }
 0xe40   :  { %v1897_v5 = vadd.f32 %v1896_v1, %v1894_v2 }
 0xe42   :  { %1899 = vst.msk [vmem:[#allocation2] sm:$0xff] %vm70_vm0, %v1897_v5 }
 0xe5c   :  { %v1854_v27 = vpop.xlane.xlu0 %1853 }
 0xe5d   :  { %v1856_v61 = vmul.f32 %v1854_v27, %v2547_v11 }
 0xe5f   :  { %v1858_v7 = vsub.f32 %v1848_v20, %v1856_v61 }
 0xe61   :  { %v1860_v8 = vmul.f32 %v1858_v7, %v1858_v7 }
 0xe63   :  { %v1864_v9 = vsel %vm70_vm0, %v1860_v8, 0.0 }
 0xe64   :  { %1865 = vadd.xlane.f32.xlu0 %v1864_v9 }
 0xed7   :  { %v1866_v58 = vpop.xlane.xlu0 %1865 }
 0xed8   :  { %v1868_v10 = vmul.f32 %v1866_v58, %v2547_v11 }
 0xeda   :  { %v1870_v55 = vadd.f32 1e-05, %v1868_v10 }
 0xedc   :  { %2173 = vrsqrt.f32 %v1870_v55  ;;  %vm1887_vm13 = vweird.f32 %v1870_v55 }
 0xee2   :  { %v2174_v44 = vpop.eup %2173 }
 0xee3   :  { %v1882_v59 = vmul.f32 %v2174_v44, %v1870_v55  ;;  %vm1888_vm12 = vweird.f32 %v2174_v44 }
 0xee4   :  { %vm1889_vm14 = vmor %vm1887_vm13, %vm1888_vm12 }
 0xee5   :  { %v1883_v26 = vmul.f32 %v2174_v44, %v1882_v59 }
 0xee7   :  { %v1884_v13 = vmul.f32 0.5, %v1883_v26 }
 0xee9   :  { %v1885_v60 = vsub.f32 1.5, %v1884_v13 }
 0xeeb   :  { %v1886_v24 = vmul.f32 %v2174_v44, %v1885_v60 }
 0xeed   :  { %v1890_v17 = vsel %vm1889_vm14, %v2174_v44, %v1886_v24 }
 0xeee   :  { %v1892_v23 = vmul.f32 %v1890_v17, %v1858_v7 }
 0xef0   :  { %v1895_v11 = vmul.f32 %v1893_v4, %v1892_v23 }
 0xef2   :  { %v1898_v28 = vadd.f32 %v1896_v1, %v1895_v11 }
 0xef4   :  { %1900 = vst.msk [vmem:[#allocation2 + $0x8] sm:$0xff] %vm70_vm0, %v1898_v28 }
 0xef5   :  { %1913 = dma.vmem_to_hbm [thread:$0]  %s1906_s11, 256, %s1908_s22, [#allocation3], %s2263_s14, %s2263_s14, %s2258_s19  }
 0xef6   :  { %2248 = dma.done.wait [#allocation3], 256  }
 0xef7   :  { %2249 = vsyncadd [#allocation3], 4294967040 }
 0xef8   :  { %2250 = dma.done.wait [#allocation5], 2048  }
 0xef9   :  { %2251 = vsyncadd [#allocation5], 4294965248 }
 0xefa   :  { %1952 = vsyncpa [#allocation3], 1 }
 0xefb   :  { %1953 = vsyncpa [#allocation5], 1 }

</bundles_post_ra>
